<compile_context>
chip_gen: v5e
topology: v5e:2x2
jax: 0.10.0
libtpu: 0.0.40
codegen_flags: <defaults>
</compile_context>

<pallas_src>
import functools

import jax
import jax.numpy as jnp
import numpy as np
from jax import lax
from jax.experimental import pallas as pl
from jax.experimental.pallas import tpu as pltpu

BN_EPS = 1e-5

# ConvTranspose2d(k=4, s=2, p=1): output row 2m+a gathers padded input rows (m+dh) with
# kernel tap kh;  a=0 -> {(dh=0,kh=3),(dh=1,kh=1)},  a=1 -> {(dh=1,kh=2),(dh=2,kh=0)}.
# The same table applies to columns (b / dw / kw).
_TAPS = {0: ((0, 3), (1, 1)), 1: ((1, 2), (2, 0))}


def _decoder_kernel(x_ref, w1_ref, s1_ref, t1_ref,
                    w2s_ref, s2_ref, t2_ref,
                    w3d_ref, s3_ref, t3_ref,
                    out_ref, y1p_ref, *, H, W):
    C4 = y1p_ref.shape[2]

    # ---- conv1 (1x1) + BN1 + ReLU : one (H*W, Cin) @ (Cin, C4) bf16 MXU matmul ----
    y1 = jnp.dot(x_ref[0], w1_ref[...], preferred_element_type=jnp.float32)
    y1 = jnp.maximum(y1 * s1_ref[...] + t1_ref[...], 0.0)            # (H*W, C4) f32

    # ---- bf16 padded scratch: re-zero only the 1-px border, overwrite the interior ----
    # (Border is re-zeroed unconditionally rather than @pl.when(program_id==0) so megacore
    #  grid partitioning can never skip the init on a core.)
    zrow = jnp.zeros((1, W + 2, C4), jnp.bfloat16)
    zcol = jnp.zeros((H + 2, 1, C4), jnp.bfloat16)
    y1p_ref[0:1, :, :] = zrow
    y1p_ref[H + 1:H + 2, :, :] = zrow
    y1p_ref[:, 0:1, :] = zcol
    y1p_ref[:, W + 1:W + 2, :] = zcol
    y1p_ref[1:H + 1, 1:W + 1, :] = y1.astype(jnp.bfloat16).reshape(H, W, C4)

    # ---- three W-shifted slabs built once; one 9-tap im2col patch for all 4 parities ----
    slabs = tuple(y1p_ref[:, dw:dw + W, :] for dw in (0, 1, 2))      # each (H+2, W, C4) bf16
    blocks = [slabs[dw][dh:dh + H] for dh in (0, 1, 2) for dw in (0, 1, 2)]
    patch = jnp.concatenate(blocks, axis=-1).reshape(H * W, 9 * C4)  # (H*W, 9*C4) bf16

    # ---- fused deconv for all 4 output parities: ONE K=9*C4, N=4*C4 matmul ----
    z = jnp.dot(patch, w2s_ref[...], preferred_element_type=jnp.float32)   # (H*W, 4*C4)
    z = jnp.maximum(z * s2_ref[...] + t2_ref[...], 0.0).astype(jnp.bfloat16)

    # ---- conv3 (1x1) for all 4 parities via block-diagonal w3: lane-dense packed output ----
    o = jnp.dot(z, w3d_ref[...], preferred_element_type=jnp.float32)       # (H*W, 4*Cout)
    out_ref[0] = jnp.maximum(o * s3_ref[...] + t3_ref[...], 0.0).astype(out_ref.dtype)


def decoder_block_linknet(x_nchw, p):
    N, Cin, H, W = x_nchw.shape
    C4 = Cin // 4
    Cout = p['w3'].shape[0]

    # NHWC with flattened spatial; bf16 activations halve input DMA and feed the MXU natively
    x2d = jnp.transpose(x_nchw, (0, 2, 3, 1)).reshape(N, H * W, Cin).astype(jnp.bfloat16)

    def fold(g, be, m, v, bias):
        scale = g / jnp.sqrt(v + BN_EPS)
        shift = scale * (bias - m) + be
        return (scale.reshape(1, -1).astype(jnp.float32),
                shift.reshape(1, -1).astype(jnp.float32))

    w1 = p['w1'][:, :, 0, 0].T.astype(jnp.bfloat16)               # (Cin, C4)
    s1, t1 = fold(p['g1'], p['be1'], p['m1'], p['v1'], p['b1'])

    # Block-sparse stacked deconv weight: row block (dh*3+dw), column block p = 2a+b.
    # Block is w2[:, :, kh(a,dh), kw(b,dw)] if (dh,dw) feeds parity (a,b), else zeros
    # (16 of 36 C4xC4 blocks are nonzero).
    w2 = p['w2']                                                   # (C4_in, C4_out, 4, 4)
    zero_blk = jnp.zeros((C4, C4), w2.dtype)
    rows = []
    for dh in (0, 1, 2):
        for dw in (0, 1, 2):
            cols = []
            for a in (0, 1):
                mh = dict(_TAPS[a])
                for b in (0, 1):
                    mw = dict(_TAPS[b])
                    cols.append(w2[:, :, mh[dh], mw[dw]]
                                if (dh in mh and dw in mw) else zero_blk)
            rows.append(jnp.concatenate(cols, axis=1))             # (C4, 4*C4)
    w2s = jnp.concatenate(rows, axis=0).astype(jnp.bfloat16)       # (9*C4, 4*C4)
    s2, t2 = fold(p['g2'], p['be2'], p['m2'], p['v2'], p['b2'])
    s2, t2 = jnp.tile(s2, (1, 4)), jnp.tile(t2, (1, 4))            # (1, 4*C4)

    # Block-diagonal conv3 weight: diag(w3, w3, w3, w3) keeps parity packing lane-dense.
    w3 = p['w3'][:, :, 0, 0].T                                     # (C4, Cout)
    w3d = jnp.kron(jnp.eye(4, dtype=w3.dtype), w3).astype(jnp.bfloat16)   # (4*C4, 4*Cout)
    s3, t3 = fold(p['g3'], p['be3'], p['m3'], p['v3'], p['b3'])
    s3, t3 = jnp.tile(s3, (1, 4)), jnp.tile(t3, (1, 4))            # (1, 4*Cout)

    def full(arr):
        nd = arr.ndim
        return pl.BlockSpec(arr.shape, lambda n, _nd=nd: (0,) * _nd)

    # Generation-aware VMEM budget: per-step live bytes, clamped so it is safe on v7x
    # (64 MiB physical) while not artificially tight on v5e/v6e.
    x_blk_bytes = H * W * Cin * 2
    out_blk_bytes = H * W * 4 * Cout * 4
    scratch_bytes = (H + 2) * (W + 2) * C4 * 2
    weight_bytes = sum(int(np.prod(a.shape)) * a.dtype.itemsize
                       for a in (w1, s1, t1, w2s, s2, t2, w3d, s3, t3))
    need = int(1.5 * (2 * x_blk_bytes + 2 * out_blk_bytes + scratch_bytes + weight_bytes))
    vmem_limit = max(16 << 20, min(need + (4 << 20), 56 << 20))

    out_packed = pl.pallas_call(
        functools.partial(_decoder_kernel, H=H, W=W),
        out_shape=jax.ShapeDtypeStruct((N, H * W, 4 * Cout), jnp.float32),
        grid=(N,),
        in_specs=[
            pl.BlockSpec((1, H * W, Cin), lambda n: (n, 0, 0)),
            full(w1), full(s1), full(t1),
            full(w2s), full(s2), full(t2),
            full(w3d), full(s3), full(t3),
        ],
        out_specs=pl.BlockSpec((1, H * W, 4 * Cout), lambda n: (n, 0, 0)),
        scratch_shapes=[pltpu.VMEM((H + 2, W + 2, C4), jnp.bfloat16)],
        compiler_params=pltpu.CompilerParams(
            dimension_semantics=("parallel",),
            vmem_limit_bytes=vmem_limit),
    )(x2d, w1, s1, t1, w2s, s2, t2, w3d, s3, t3)

    # un-interleave parities: packed[n, m*W+q, (2a+b)*Cout + c] -> y[n, c, 2m+a, 2q+b]
    y = out_packed.reshape(N, H, W, 2, 2, Cout)
    y = jnp.transpose(y, (0, 5, 1, 3, 2, 4)).reshape(N, Cout, 2 * H, 2 * W)
    return y


def reference(x, p):
    """Pure-JAX reference (NCHW), inference-mode BN, for validation."""
    def bn_relu(y, g, be, m, v):
        s = (g / jnp.sqrt(v + BN_EPS))[None, :, None, None]
        return jnp.maximum(s * (y - m[None, :, None, None]) + be[None, :, None, None], 0.0)

    dn = ('NCHW', 'OIHW', 'NCHW')
    y = lax.conv_general_dilated(x, p['w1'], (1, 1), 'VALID', dimension_numbers=dn)
    y = bn_relu(y + p['b1'][None, :, None, None], p['g1'], p['be1'], p['m1'], p['v1'])
    # ConvTranspose2d(k4, s2, p1) == dilated conv with spatially-flipped, in/out-swapped weight
    wf = jnp.transpose(jnp.flip(p['w2'], (2, 3)), (1, 0, 2, 3))
    y = lax.conv_general_dilated(y, wf, (1, 1), [(2, 2), (2, 2)],
                                 lhs_dilation=(2, 2), dimension_numbers=dn)
    y = bn_relu(y + p['b2'][None, :, None, None], p['g2'], p['be2'], p['m2'], p['v2'])
    y = lax.conv_general_dilated(y, p['w3'], (1, 1), 'VALID', dimension_numbers=dn)
    y = bn_relu(y + p['b3'][None, :, None, None], p['g3'], p['be3'], p['m3'], p['v3'])
    return y


if __name__ == "__main__":
    key = jax.random.PRNGKey(0)
    N, Cin, H, W = 2, 64, 16, 16
    C4, Cout = Cin // 4, 32            # 4*Cout = 128 -> lane-dense packed output
    ks = jax.random.split(key, 20)

    def bn_params(k0, k1, k2, k3, c):
        return {'g': 1.0 + 0.1 * jax.random.normal(k0, (c,), jnp.float32),
                'be': 0.1 * jax.random.normal(k1, (c,), jnp.float32),
                'm': 0.1 * jax.random.normal(k2, (c,), jnp.float32),
                'v': jax.random.uniform(k3, (c,), jnp.float32, 0.5, 1.5)}

    bn1 = bn_params(ks[2], ks[3], ks[4], ks[5], C4)
    bn2 = bn_params(ks[8], ks[9], ks[10], ks[11], C4)
    bn3 = bn_params(ks[14], ks[15], ks[16], ks[17], Cout)

    p = {
        'w1': 0.2 * jax.random.normal(ks[0], (C4, Cin, 1, 1), jnp.float32),
        'b1': 0.1 * jax.random.normal(ks[1], (C4,), jnp.float32),
        'g1': bn1['g'], 'be1': bn1['be'], 'm1': bn1['m'], 'v1': bn1['v'],
        'w2': 0.15 * jax.random.normal(ks[6], (C4, C4, 4, 4), jnp.float32),
        'b2': 0.1 * jax.random.normal(ks[7], (C4,), jnp.float32),
        'g2': bn2['g'], 'be2': bn2['be'], 'm2': bn2['m'], 'v2': bn2['v'],
        'w3': 0.15 * jax.random.normal(ks[12], (Cout, C4, 1, 1), jnp.float32),
        'b3': 0.1 * jax.random.normal(ks[13], (Cout,), jnp.float32),
        'g3': bn3['g'], 'be3': bn3['be'], 'm3': bn3['m'], 'v3': bn3['v'],
    }

    x = jax.random.normal(ks[19], (N, Cin, H, W), jnp.float32)

    out = jax.block_until_ready(decoder_block_linknet(x, p))
    assert out.shape == (N, Cout, 2 * H, 2 * W), out.shape

    ref = jax.block_until_ready(reference(x, p))
    # bf16 MXU operands vs f32 reference across three chained matmuls -> loose tolerance
    np.testing.assert_allclose(np.asarray(out), np.asarray(ref), rtol=5e-2, atol=1e-1)

    print("KERNEL_OK")
</pallas_src>

<mosaic_0001>
module attributes {stable_mosaic.version = 11 : i64} {
  func.func @_decoder_kernel(%arg0: i32, %arg1: memref<1x256x64xbf16, #tpu.memory_space<vmem>>, %arg2: memref<64x16xbf16, #tpu.memory_space<vmem>>, %arg3: memref<1x16xf32, #tpu.memory_space<vmem>>, %arg4: memref<1x16xf32, #tpu.memory_space<vmem>>, %arg5: memref<144x64xbf16, #tpu.memory_space<vmem>>, %arg6: memref<1x64xf32, #tpu.memory_space<vmem>>, %arg7: memref<1x64xf32, #tpu.memory_space<vmem>>, %arg8: memref<64x128xbf16, #tpu.memory_space<vmem>>, %arg9: memref<1x128xf32, #tpu.memory_space<vmem>>, %arg10: memref<1x128xf32, #tpu.memory_space<vmem>>, %arg11: memref<1x256x128xf32, #tpu.memory_space<vmem>>, %arg12: memref<18x18x16xbf16, #tpu.memory_space<vmem>>) attributes {dimension_semantics = [#tpu.dimension_semantics<parallel>], iteration_bounds = array<i64: 2>, scalar_prefetch = 0 : i64, scratch_operands = 1 : i64, tpu.core_type = #tpu.core_type<tc>, window_params = [{transform_indices = @transform_0, window_bounds = array<i64: 1, 256, 64>}, {pipeline_mode = #tpu.pipeline_mode<synchronous>, transform_indices = @transform_1, window_bounds = array<i64: 64, 16>}, {pipeline_mode = #tpu.pipeline_mode<synchronous>, transform_indices = @transform_2, window_bounds = array<i64: 1, 16>}, {pipeline_mode = #tpu.pipeline_mode<synchronous>, transform_indices = @transform_3, window_bounds = array<i64: 1, 16>}, {pipeline_mode = #tpu.pipeline_mode<synchronous>, transform_indices = @transform_4, window_bounds = array<i64: 144, 64>}, {pipeline_mode = #tpu.pipeline_mode<synchronous>, transform_indices = @transform_5, window_bounds = array<i64: 1, 64>}, {pipeline_mode = #tpu.pipeline_mode<synchronous>, transform_indices = @transform_6, window_bounds = array<i64: 1, 64>}, {pipeline_mode = #tpu.pipeline_mode<synchronous>, transform_indices = @transform_7, window_bounds = array<i64: 64, 128>}, {pipeline_mode = #tpu.pipeline_mode<synchronous>, transform_indices = @transform_8, window_bounds = array<i64: 1, 128>}, {pipeline_mode = #tpu.pipeline_mode<synchronous>, transform_indices = @transform_9, window_bounds = array<i64: 1, 128>}, {transform_indices = @transform_10, window_bounds = array<i64: 1, 256, 128>}]} {
    %c0 = arith.constant 0 : index
    %c0_0 = arith.constant 0 : index
    %c0_1 = arith.constant 0 : index
    %0 = vector.load %arg1[%c0, %c0_0, %c0_1] : memref<1x256x64xbf16, #tpu.memory_space<vmem>>, vector<1x256x64xbf16>
    %1 = vector.shape_cast %0 : vector<1x256x64xbf16> to vector<256x64xbf16>
    %c0_2 = arith.constant 0 : index
    %c0_3 = arith.constant 0 : index
    %2 = vector.load %arg2[%c0_2, %c0_3] : memref<64x16xbf16, #tpu.memory_space<vmem>>, vector<64x16xbf16>
    %cst = arith.constant dense<0.000000e+00> : vector<256x16xf32>
    %3 = tpu.matmul %1, %2, %cst {dimension_numbers = #tpu.dot_dimension_numbers<[1], [0], [0], [1], [0, 0, 1, 1], [], []>} : vector<256x64xbf16>, vector<64x16xbf16>, vector<256x16xf32> -> vector<256x16xf32>
    %c0_4 = arith.constant 0 : index
    %c0_5 = arith.constant 0 : index
    %4 = vector.load %arg3[%c0_4, %c0_5] : memref<1x16xf32, #tpu.memory_space<vmem>>, vector<1x16xf32>
    %5 = vector.broadcast %4 : vector<1x16xf32> to vector<256x16xf32>
    %6 = arith.mulf %3, %5 : vector<256x16xf32>
    %c0_6 = arith.constant 0 : index
    %c0_7 = arith.constant 0 : index
    %7 = vector.load %arg4[%c0_6, %c0_7] : memref<1x16xf32, #tpu.memory_space<vmem>>, vector<1x16xf32>
    %8 = vector.broadcast %7 : vector<1x16xf32> to vector<256x16xf32>
    %9 = arith.addf %6, %8 : vector<256x16xf32>
    %cst_8 = arith.constant 0.000000e+00 : f32
    %10 = vector.broadcast %cst_8 : f32 to vector<256x16xf32>
    %11 = arith.maximumf %9, %10 : vector<256x16xf32>
    %cst_9 = arith.constant 0.000000e+00 : bf16
    %12 = vector.broadcast %cst_9 : bf16 to vector<1x18x16xbf16>
    %cst_10 = arith.constant 0.000000e+00 : bf16
    %13 = vector.broadcast %cst_10 : bf16 to vector<18x1x16xbf16>
    %c0_11 = arith.constant 0 : index
    %c0_12 = arith.constant 0 : index
    %c0_13 = arith.constant 0 : index
    %14 = vector.load %arg12[%c0_11, %c0_12, %c0_13] : memref<18x18x16xbf16, #tpu.memory_space<vmem>>, vector<1x18x16xbf16>
    tpu.vector_store %arg12[%c0_11, %c0_12, %c0_13], %12 {strides = array<i32>} : memref<18x18x16xbf16, #tpu.memory_space<vmem>>, vector<1x18x16xbf16>,
    %c17 = arith.constant 17 : index
    %c0_14 = arith.constant 0 : index
    %c0_15 = arith.constant 0 : index
    %15 = vector.load %arg12[%c17, %c0_14, %c0_15] : memref<18x18x16xbf16, #tpu.memory_space<vmem>>, vector<1x18x16xbf16>
    tpu.vector_store %arg12[%c17, %c0_14, %c0_15], %12 {strides = array<i32>} : memref<18x18x16xbf16, #tpu.memory_space<vmem>>, vector<1x18x16xbf16>,
    %c0_16 = arith.constant 0 : index
    %c0_17 = arith.constant 0 : index
    %c0_18 = arith.constant 0 : index
    %16 = vector.load %arg12[%c0_16, %c0_17, %c0_18] : memref<18x18x16xbf16, #tpu.memory_space<vmem>>, vector<18x1x16xbf16>
    tpu.vector_store %arg12[%c0_16, %c0_17, %c0_18], %13 {strides = array<i32>} : memref<18x18x16xbf16, #tpu.memory_space<vmem>>, vector<18x1x16xbf16>,
    %c0_19 = arith.constant 0 : index
    %c17_20 = arith.constant 17 : index
    %c0_21 = arith.constant 0 : index
    %17 = vector.load %arg12[%c0_19, %c17_20, %c0_21] : memref<18x18x16xbf16, #tpu.memory_space<vmem>>, vector<18x1x16xbf16>
    tpu.vector_store %arg12[%c0_19, %c17_20, %c0_21], %13 {strides = array<i32>} : memref<18x18x16xbf16, #tpu.memory_space<vmem>>, vector<18x1x16xbf16>,
    %18 = arith.truncf %11 : vector<256x16xf32> to vector<256x16xbf16>
    %19 = vector.shape_cast %18 : vector<256x16xbf16> to vector<16x16x16xbf16>
    %c1 = arith.constant 1 : index
    %c1_22 = arith.constant 1 : index
    %c0_23 = arith.constant 0 : index
    %20 = vector.load %arg12[%c1, %c1_22, %c0_23] : memref<18x18x16xbf16, #tpu.memory_space<vmem>>, vector<16x16x16xbf16>
    tpu.vector_store %arg12[%c1, %c1_22, %c0_23], %19 {strides = array<i32>} : memref<18x18x16xbf16, #tpu.memory_space<vmem>>, vector<16x16x16xbf16>,
    %c0_24 = arith.constant 0 : index
    %c0_25 = arith.constant 0 : index
    %c0_26 = arith.constant 0 : index
    %21 = vector.load %arg12[%c0_24, %c0_25, %c0_26] : memref<18x18x16xbf16, #tpu.memory_space<vmem>>, vector<18x16x16xbf16>
    %c0_27 = arith.constant 0 : index
    %c1_28 = arith.constant 1 : index
    %c0_29 = arith.constant 0 : index
    %22 = vector.load %arg12[%c0_27, %c1_28, %c0_29] : memref<18x18x16xbf16, #tpu.memory_space<vmem>>, vector<18x16x16xbf16>
    %c0_30 = arith.constant 0 : index
    %c2 = arith.constant 2 : index
    %c0_31 = arith.constant 0 : index
    %23 = vector.load %arg12[%c0_30, %c2, %c0_31] : memref<18x18x16xbf16, #tpu.memory_space<vmem>>, vector<18x16x16xbf16>
    %24 = vector.extract_strided_slice %21 {offsets = [0, 0, 0], sizes = [16, 16, 16], strides = [1, 1, 1]} : vector<18x16x16xbf16> to vector<16x16x16xbf16>
    %25 = vector.extract_strided_slice %22 {offsets = [0, 0, 0], sizes = [16, 16, 16], strides = [1, 1, 1]} : vector<18x16x16xbf16> to vector<16x16x16xbf16>
    %26 = vector.extract_strided_slice %23 {offsets = [0, 0, 0], sizes = [16, 16, 16], strides = [1, 1, 1]} : vector<18x16x16xbf16> to vector<16x16x16xbf16>
    %27 = vector.extract_strided_slice %21 {offsets = [1, 0, 0], sizes = [16, 16, 16], strides = [1, 1, 1]} : vector<18x16x16xbf16> to vector<16x16x16xbf16>
    %28 = vector.extract_strided_slice %22 {offsets = [1, 0, 0], sizes = [16, 16, 16], strides = [1, 1, 1]} : vector<18x16x16xbf16> to vector<16x16x16xbf16>
    %29 = vector.extract_strided_slice %23 {offsets = [1, 0, 0], sizes = [16, 16, 16], strides = [1, 1, 1]} : vector<18x16x16xbf16> to vector<16x16x16xbf16>
    %30 = vector.extract_strided_slice %21 {offsets = [2, 0, 0], sizes = [16, 16, 16], strides = [1, 1, 1]} : vector<18x16x16xbf16> to vector<16x16x16xbf16>
    %31 = vector.extract_strided_slice %22 {offsets = [2, 0, 0], sizes = [16, 16, 16], strides = [1, 1, 1]} : vector<18x16x16xbf16> to vector<16x16x16xbf16>
    %32 = vector.extract_strided_slice %23 {offsets = [2, 0, 0], sizes = [16, 16, 16], strides = [1, 1, 1]} : vector<18x16x16xbf16> to vector<16x16x16xbf16>
    %33 = tpu.concatenate %24, %25, %26, %27, %28, %29, %30, %31, %32 in 2 : vector<16x16x16xbf16>, vector<16x16x16xbf16>, vector<16x16x16xbf16>, vector<16x16x16xbf16>, vector<16x16x16xbf16>, vector<16x16x16xbf16>, vector<16x16x16xbf16>, vector<16x16x16xbf16>, vector<16x16x16xbf16> -> vector<16x16x144xbf16>
    %34 = vector.shape_cast %33 : vector<16x16x144xbf16> to vector<256x144xbf16>
    %c0_32 = arith.constant 0 : index
    %c0_33 = arith.constant 0 : index
    %35 = vector.load %arg5[%c0_32, %c0_33] : memref<144x64xbf16, #tpu.memory_space<vmem>>, vector<144x64xbf16>
    %cst_34 = arith.constant dense<0.000000e+00> : vector<256x64xf32>
    %36 = tpu.matmul %34, %35, %cst_34 {dimension_numbers = #tpu.dot_dimension_numbers<[1], [0], [0], [1], [0, 0, 1, 1], [], []>} : vector<256x144xbf16>, vector<144x64xbf16>, vector<256x64xf32> -> vector<256x64xf32>
    %c0_35 = arith.constant 0 : index
    %c0_36 = arith.constant 0 : index
    %37 = vector.load %arg6[%c0_35, %c0_36] : memref<1x64xf32, #tpu.memory_space<vmem>>, vector<1x64xf32>
    %38 = vector.broadcast %37 : vector<1x64xf32> to vector<256x64xf32>
    %39 = arith.mulf %36, %38 : vector<256x64xf32>
    %c0_37 = arith.constant 0 : index
    %c0_38 = arith.constant 0 : index
    %40 = vector.load %arg7[%c0_37, %c0_38] : memref<1x64xf32, #tpu.memory_space<vmem>>, vector<1x64xf32>
    %41 = vector.broadcast %40 : vector<1x64xf32> to vector<256x64xf32>
    %42 = arith.addf %39, %41 : vector<256x64xf32>
    %cst_39 = arith.constant 0.000000e+00 : f32
    %43 = vector.broadcast %cst_39 : f32 to vector<256x64xf32>
    %44 = arith.maximumf %42, %43 : vector<256x64xf32>
    %45 = arith.truncf %44 : vector<256x64xf32> to vector<256x64xbf16>
    %c0_40 = arith.constant 0 : index
    %c0_41 = arith.constant 0 : index
    %46 = vector.load %arg8[%c0_40, %c0_41] : memref<64x128xbf16, #tpu.memory_space<vmem>>, vector<64x128xbf16>
    %cst_42 = arith.constant dense<0.000000e+00> : vector<256x128xf32>
    %47 = tpu.matmul %45, %46, %cst_42 {dimension_numbers = #tpu.dot_dimension_numbers<[1], [0], [0], [1], [0, 0, 1, 1], [], []>} : vector<256x64xbf16>, vector<64x128xbf16>, vector<256x128xf32> -> vector<256x128xf32>
    %c0_43 = arith.constant 0 : index
    %c0_44 = arith.constant 0 : index
    %48 = vector.load %arg9[%c0_43, %c0_44] : memref<1x128xf32, #tpu.memory_space<vmem>>, vector<1x128xf32>
    %49 = vector.broadcast %48 : vector<1x128xf32> to vector<256x128xf32>
    %50 = arith.mulf %47, %49 : vector<256x128xf32>
    %c0_45 = arith.constant 0 : index
    %c0_46 = arith.constant 0 : index
    %51 = vector.load %arg10[%c0_45, %c0_46] : memref<1x128xf32, #tpu.memory_space<vmem>>, vector<1x128xf32>
    %52 = vector.broadcast %51 : vector<1x128xf32> to vector<256x128xf32>
    %53 = arith.addf %50, %52 : vector<256x128xf32>
    %cst_47 = arith.constant 0.000000e+00 : f32
    %54 = vector.broadcast %cst_47 : f32 to vector<256x128xf32>
    %55 = arith.maximumf %53, %54 : vector<256x128xf32>
    %c0_48 = arith.constant 0 : index
    %c0_49 = arith.constant 0 : index
    %c0_50 = arith.constant 0 : index
    %56 = vector.load %arg11[%c0_48, %c0_49, %c0_50] : memref<1x256x128xf32, #tpu.memory_space<vmem>>, vector<1x256x128xf32>
    %57 = vector.shape_cast %56 : vector<1x256x128xf32> to vector<256x128xf32>
    %58 = vector.shape_cast %55 : vector<256x128xf32> to vector<1x256x128xf32>
    tpu.vector_store %arg11[%c0_48, %c0_49, %c0_50], %58 {strides = array<i32>} : memref<1x256x128xf32, #tpu.memory_space<vmem>>, vector<1x256x128xf32>,
    return
  }
  func.func @transform_0(%arg0: i32) -> (i32, i32, i32) {
    %c0_i32 = arith.constant 0 : i32
    %c0_i32_0 = arith.constant 0 : i32
    %c0_i32_1 = arith.constant 0 : i32
    return %arg0, %c0_i32, %c0_i32_0 : i32, i32, i32
  }
  func.func @transform_1(%arg0: i32) -> (i32, i32) {
    %c0_i32 = arith.constant 0 : i32
    %c0_i32_0 = arith.constant 0 : i32
    %c0_i32_1 = arith.constant 0 : i32
    return %c0_i32, %c0_i32_0 : i32, i32
  }
  func.func @transform_2(%arg0: i32) -> (i32, i32) {
    %c0_i32 = arith.constant 0 : i32
    %c0_i32_0 = arith.constant 0 : i32
    %c0_i32_1 = arith.constant 0 : i32
    return %c0_i32, %c0_i32_0 : i32, i32
  }
  func.func @transform_3(%arg0: i32) -> (i32, i32) {
    %c0_i32 = arith.constant 0 : i32
    %c0_i32_0 = arith.constant 0 : i32
    %c0_i32_1 = arith.constant 0 : i32
    return %c0_i32, %c0_i32_0 : i32, i32
  }
  func.func @transform_4(%arg0: i32) -> (i32, i32) {
    %c0_i32 = arith.constant 0 : i32
    %c0_i32_0 = arith.constant 0 : i32
    %c0_i32_1 = arith.constant 0 : i32
    return %c0_i32, %c0_i32_0 : i32, i32
  }
  func.func @transform_5(%arg0: i32) -> (i32, i32) {
    %c0_i32 = arith.constant 0 : i32
    %c0_i32_0 = arith.constant 0 : i32
    %c0_i32_1 = arith.constant 0 : i32
    return %c0_i32, %c0_i32_0 : i32, i32
  }
  func.func @transform_6(%arg0: i32) -> (i32, i32) {
    %c0_i32 = arith.constant 0 : i32
    %c0_i32_0 = arith.constant 0 : i32
    %c0_i32_1 = arith.constant 0 : i32
    return %c0_i32, %c0_i32_0 : i32, i32
  }
  func.func @transform_7(%arg0: i32) -> (i32, i32) {
    %c0_i32 = arith.constant 0 : i32
    %c0_i32_0 = arith.constant 0 : i32
    %c0_i32_1 = arith.constant 0 : i32
    return %c0_i32, %c0_i32_0 : i32, i32
  }
  func.func @transform_8(%arg0: i32) -> (i32, i32) {
    %c0_i32 = arith.constant 0 : i32
    %c0_i32_0 = arith.constant 0 : i32
    %c0_i32_1 = arith.constant 0 : i32
    return %c0_i32, %c0_i32_0 : i32, i32
  }
  func.func @transform_9(%arg0: i32) -> (i32, i32) {
    %c0_i32 = arith.constant 0 : i32
    %c0_i32_0 = arith.constant 0 : i32
    %c0_i32_1 = arith.constant 0 : i32
    return %c0_i32, %c0_i32_0 : i32, i32
  }
  func.func @transform_10(%arg0: i32) -> (i32, i32, i32) {
    %c0_i32 = arith.constant 0 : i32
    %c0_i32_0 = arith.constant 0 : i32
    %c0_i32_1 = arith.constant 0 : i32
    return %arg0, %c0_i32, %c0_i32_0 : i32, i32, i32
  }
}

</mosaic_0001>

<bundles_post_ra>
// kernel: tpu_custom_call.1
= control target key start
LH: loop header
LB: loop body
LE: loop exit
PB: predicated region body
PF: predicated region fallthrough
CT: control target
= control target key end

     0   :  { %15 = vsyncpa [#allocation4], 0  ;;  %s4962_s0 = inlined_call_operand.vmem [shape: bf16[2,256,64], index: 0, kind: input, shape index: {}]   ;;  %s4963_s1 = inlined_call_operand.vmem [shape: bf16[64,16], index: 1, kind: input, shape index: {}]   ;;  %s4964_s2 = inlined_call_operand.vmem [shape: f32[1,16], index: 2, kind: input, shape index: {}]   ;;  %s4965_s3 = inlined_call_operand.vmem [shape: f32[1,16], index: 3, kind: input, shape index: {}]   ;;  %s4966_s4 = inlined_call_operand.vmem [shape: bf16[144,64], index: 4, kind: input, shape index: {}]   ;;  %s4967_s5 = inlined_call_operand.vmem [shape: f32[1,64], index: 5, kind: input, shape index: {}]   ;;  %s4968_s6 = inlined_call_operand.vmem [shape: f32[1,64], index: 6, kind: input, shape index: {}]   ;;  %s4969_s7 = inlined_call_operand.vmem [shape: bf16[64,128], index: 7, kind: input, shape index: {}]   ;;  %s4970_s8 = inlined_call_operand.vmem [shape: f32[1,128], index: 8, kind: input, shape index: {}]   ;;  %s4971_s9 = inlined_call_operand.vmem [shape: f32[1,128], index: 9, kind: input, shape index: {}]   ;;  %s4972_s10 = inlined_call_operand.hbm [shape: f32[2,256,128], index: 10, kind: output, shape index: {}]  }
   0x1   :  { %17 = vsyncpa [#allocation4 + $0x1], 0  ;;  %s3665_s13 = smov 0   ;;  %s3667_s14 = smov 0  }
   0x2   :  { %s3669_s15 = smov 0   ;;  %s3671_s16 = smov 0  }
   0x3 LB: > { %s3686_s17 = sadd.s32 4294967295, %s3598_s16   ;;  %s3149_s18 = sadd.s32 4294967294, %s3598_s16   ;;  %s3598_s16 = sphi %s3671_s16, %s4992_s16   ;;  %s3594_s15 = sphi %s3669_s15, %s4991_s15   ;;  %s3590_s14 = sphi %s3667_s14, %s4990_s14   ;;  %s3586_s13 = sphi %s3665_s13, %s4989_s13  }
   0x4   : > { %s3690_s19 = sadd.s32 1, %s3598_s16   ;;  %s245_s20 = sadd.s32 1, %s3594_s15 }
   0x5   : > { %s242_s21 = ssub.s32 %s3598_s16, %s3690_s19  ;;  %p255_p0 = scmp.ne.s32.totalorder %s3594_s15, %s3590_s14 }
   0x6   : > { %p243_p1 = scmp.eq.s32.totalorder %s242_s21, 0  ;;  %p256_p2 = scmp.eq.s32.totalorder %s3686_s17, 1 }
   0x7   : > { %p261_p3 = scmp.ne.s32.totalorder %s3590_s14, %s3586_s13  ;;  %p262_p4 = scmp.eq.s32.totalorder %s3149_s18, 1 }
   0x8   : > { %s3701_s22 = scalar_select %p243_p1, %s3594_s15, %s245_s20  }
   0x9   : > { %p3703_p5 = por %p256_p2, %p255_p0  ;;  %p3707_p6 = por %p262_p4, %p261_p3 }
   0xa   : > { %p3152_p7 = scmp.ge.s32.totalorder %s3598_s16, 1  ;;  %p315_p8 = scmp.lt.s32.totalorder %s3598_s16, 3 }
   0xc   : > { %p316_p9 = pnand %p3152_p7, %p315_p8 }
   0xd   : > { %p353_p10 = scmp.lt.s32.totalorder (!%p316_p9), %s3686_s17, 1  ;;  %s3601_s27 = smov (!%p316_p9), 32  }
   0xe   : > { %319 = sbr.rel (%p316_p9) target bundleno = 899 (0x383), region = 60  ;;  %s4975_s21 = smov (!%p316_p9), 48  }
   0xf   : > { %s3604_s25 = smov (!%p316_p9), 80   ;;  %s3605_s28 = smov (!%p316_p9), 64  }
  0x10   : > { %s3607_s30 = smov (!%p316_p9), 112   ;;  %s3375_s18 = sshll.u32 (!%p316_p9), %s3686_s17, 8 }
  0x11   : > { %s3083_s11 = scalar_lea.hbm (!%p316_p9), %s4972_s10, %s3375_s18  ;;  %s3541_s20 = scalar_lea.hbm (!%p316_p9), %s4972_s10, 512 }
  0x13   : > { %v3361_v0 = vld [vmem:[%s4963_s1 + $0x18] sm:$0xff]  ;;  %v3360_v1 = vld [vmem:[%s4963_s1 + $0x10] sm:$0xff]  ;;  %s354_s29 = scalar_select %p353_p10, %s3686_s17, 1  ;;  %v3359_v2 = vld [vmem:[%s4963_s1 + $0x8] sm:$0xff]  ;;  %vm503_vm0 = vcmask 523264   ;;  %vm748_vm1 = vcmask 122880  }
  0x14   : > { %556 = vmatpush.bf16.msra.mxu0 %v3361_v0  ;;  %v3358_v3 = vld [vmem:[%s4963_s1] sm:$0xff]  ;;  %v3600_v11 = vmov 0   ;;  %vm755_vm2 = vsmask.f32 256  ;;  %vm745_vm3 = vcmask 125952   ;;  %vm1809_vm7 = vcmask 1046528  }
  0x15   : > { %s3341_s12 = sshll.u32 %s354_s29, 7  ;;  %749 = vst.msk [vmem:[#allocation2 + $0x8] sm:$0x1] %vm748_vm1, %v3600_v11  ;;  %vm3747_vm4 = vmand %vm748_vm1, %vm755_vm2  ;;  %v760_v13 = vld [vmem:[#allocation2 + $0xc] sm:$0x1]  ;;  %vm2102_vm12 = vcmask 130048  }
  0x16   : > { %s3730_s26 = scalar_lea.vmem %s4962_s0, %s3341_s12  ;;  %753 = vst.msk [vmem:[#allocation2 + $0xd4] sm:$0x1] %vm748_vm1, %v3600_v11  ;;  %vm811_vm5 = vsmask.f32 7938  ;;  %v761_v14 = vsel %vm3747_vm4, 0, %v760_v13  ;;  %s4973_s12 = smov 16  }
  0x17   : > { %v3342_v4 = vld [vmem:[%s3730_s26] sm:$0xff]  ;;  %v3343_v5 = vld [vmem:[%s3730_s26 + $0x8] sm:$0xff]  ;;  %v3344_v6 = vld [vmem:[%s3730_s26 + $0x10] sm:$0xff]  ;;  %746 = vst.msk [vmem:[#allocation2] sm:$0xf] %vm745_vm3, %v3600_v11  ;;  %s3606_s29 = smov 96  }
  0x18   : > { %557 = vmatpush.bf16.msra.mxu0 %v3360_v1  ;;  %v3345_v7 = vld [vmem:[%s3730_s26 + $0x18] sm:$0xff]  ;;  %v3346_v8 = vld [vmem:[%s3730_s26 + $0x20] sm:$0xff]  ;;  %v3347_v9 = vld [vmem:[%s3730_s26 + $0x28] sm:$0xff]  ;;  %762 = vst [vmem:[#allocation2 + $0xc] sm:$0x1] %v761_v14  ;;  %vm2135_vm13 = vcmask 261120  }
  0x19   : > { %v3348_v10 = vld [vmem:[%s3730_s26 + $0x30] sm:$0xff]  ;;  %vm3754_vm6 = vmand %vm748_vm1, %vm811_vm5  ;;  %747 = vst.msk [vmem:[#allocation2 + $0x4] sm:$0xf] %vm745_vm3, %v3600_v11  ;;  %v3349_v20 = vld [vmem:[%s3730_s26 + $0x38] sm:$0xff]  ;;  %vm1536_vm8 = vsmask.f32 7424 }
  0x1a   : > { %751 = vst.msk [vmem:[#allocation2 + $0xcc] sm:$0xf] %vm745_vm3, %v3600_v11  ;;  %v816_v18 = vld [vmem:[#allocation2 + $0x14] sm:$0x1]  ;;  %v763_v31 = vld [vmem:[#allocation2 + $0x18] sm:$0x1]  ;;  %vm3798_vm9 = vmand %vm745_vm3, %vm811_vm5 }
  0x1b   : > { %752 = vst.msk [vmem:[#allocation2 + $0xd0] sm:$0xf] %vm745_vm3, %v3600_v11  ;;  %v817_v19 = vsel %vm3754_vm6, 0, %v816_v18  ;;  %v764_v32 = vsel %vm3747_vm4, 0, %v763_v31  ;;  %v3777_v39 = vld [vmem:[%s4964_s2] ss:$0 sm:$0xff] }
  0x1c   : > { %558 = vmatpush.bf16.msra.mxu0 %v3359_v2  ;;  %v813_v16 = vld [vmem:[#allocation2 + $0x8] sm:$0x1]  ;;  %818 = vst [vmem:[#allocation2 + $0x14] sm:$0x1] %v817_v19  ;;  %v819_v42 = vld [vmem:[#allocation2 + $0x20] sm:$0x1] }
  0x1d   : > { %v814_v17 = vsel %vm3754_vm6, 0, %v813_v16  ;;  %765 = vst [vmem:[#allocation2 + $0x18] sm:$0x1] %v764_v32  ;;  %v3782_v43 = vld [vmem:[%s4965_s3] ss:$0 sm:$0xff]  ;;  %v820_v45 = vsel %vm3754_vm6, 0, %v819_v42 }
  0x1e   : > { %815 = vst [vmem:[#allocation2 + $0x8] sm:$0x1] %v814_v17  ;;  %v757_v21 = vld [vmem:[#allocation2] sm:$0x1]  ;;  %v3421_v26 = vld [vmem:[#allocation2] sm:$0xe] }
  0x1f   : > { %v758_v23 = vsel %vm3747_vm4, 0, %v757_v21  ;;  %v3350_v44 = vld [vmem:[%s3730_s26 + $0x40] sm:$0xff]  ;;  %821 = vst [vmem:[#allocation2 + $0x20] sm:$0x1] %v820_v45  ;;  %v1224_v61 = vld [vmem:[#allocation2 + $0xc] sm:$0xf] }
  0x20   : > { %559 = vmatpush.bf16.msra.mxu0 %v3358_v3  ;;  %759 = vst [vmem:[#allocation2] sm:$0x1] %v758_v23  ;;  %v3420_v25 = vld [vmem:[#allocation2] sm:$0xf0]  ;;  %v822_v0 = vld [vmem:[#allocation2 + $0x2c] sm:$0x1] }
  0x21   : > { %v3422_v28 = vor.u32 %v3421_v26, %v3420_v25  ;;  %v766_v51 = vld [vmem:[#allocation2 + $0x24] sm:$0x1]  ;;  %v3351_v3 = vld [vmem:[%s3730_s26 + $0x48] sm:$0xff]  ;;  %vm899_vm10 = vsmask.f32 4368  ;;  %vm2168_vm14 = vcmask 392192  }
  0x22   : > { %v767_v53 = vsel %vm3747_vm4, 0, %v766_v51  ;;  %vm3811_vm11 = vmor %vm755_vm2, %vm899_vm10  ;;  %v3370_v14 = vld [vmem:[%s4966_s4 + $0x40] sm:$0xff]  ;;  %v769_v26 = vld [vmem:[#allocation2 + $0x30] sm:$0x1]  ;;  %vm2233_vm15 = vcmask 654336   ;;  %vm2266_vm1 = vcmask 785408  }
  0x23   : > { %3236 = vmatmul.msk.bf16.vlgmr.msra.gmra.mxu0 %vm503_vm0, %v3342_v4  ;;  %v1810_v29 = vrot.slane %v3422_v28, 1  ;;  %768 = vst [vmem:[#allocation2 + $0x24] sm:$0x1] %v767_v53  ;;  %v823_v4 = vsel %vm3754_vm6, 0, %v822_v0  ;;  %v1228_v13 = vld [vmem:[#allocation2 + $0x14] sm:$0x1]  ;;  %2564 = vmatpush.bf16.msra.mxu2 %v3370_v14 }
  0x24   : > { %824 = vst [vmem:[#allocation2 + $0x2c] sm:$0x1] %v823_v4  ;;  %v1231_v31 = vld [vmem:[#allocation2 + $0x18] sm:$0xf]  ;;  %v772_v14 = vld [vmem:[#allocation2 + $0x3c] sm:$0x1] }
  0x25   : > { %v1372_v22 = vld [vmem:[#allocation2 + $0x8] sm:$0x1]  ;;  %vm2299_vm2 = vcmask 916480   ;;  %v3373_v12 = vld [vmem:[%s4969_s7 + $0x10] sm:$0xff] }
  0x26   : > { %v1504_v24 = vunpack.c.l.b16 %v1372_v22 }
  0x27   : > { %v3377_v34 = vld [vmem:[#allocation2] sm:$0xff]  }
  0x28   : > { %v1520_v27 = vpack.c.b16 %v1504_v24, %v1504_v24  ;;  %v1540_v35 = vshll.u32 %v3377_v34, 16  ;;  %v1538_v36 = vshrl.u32 %v3377_v34, 16 }
  0x2a   : > { %v1811_v30 = vrot.slane %v1520_v27, 1  ;;  %v1542_v37 = vrot.slane %v1540_v35, 1  ;;  %v1545_v38 = vshll.u32 %v1520_v27, 16  ;;  %v770_v27 = vsel %vm3747_vm4, 0, %v769_v26 }
  0x2b   : > { %771 = vst [vmem:[#allocation2 + $0x30] sm:$0x1] %v770_v27 }
  0x2c   : > { %v1812_v33 = vsel %vm1809_vm7, %v1810_v29, %v1811_v30  ;;  %v1543_v40 = vor.u32 %v1542_v37, %v1538_v36  ;;  %v1547_v41 = vrot.slane %v1545_v38, 1 }
  0x2d   : > { %1858 = vrot.lane.b32.xlu0 %v1812_v33, %s3601_s27 }
  0x2e   : > { %v1548_v46 = vsel %vm1536_vm8, %v1543_v40, %v1547_v41  ;;  %v3352_v40 = vld [vmem:[%s3730_s26 + $0x50] sm:$0xff]  ;;  %v825_v41 = vld [vmem:[#allocation2 + $0x38] sm:$0x1] }
  0x2f   : > { %v826_v45 = vsel %vm3754_vm6, 0, %v825_v41 }
  0x30   : > { %827 = vst [vmem:[#allocation2 + $0x38] sm:$0x1] %v826_v45 }
  0x33   : > { %3237 = vmatmul.msk.bf16.gmra.mxu0 %vm503_vm0, %v3343_v5 }
  0x35   : > { %1729 = vrot.lane.b32.xlu0 %v1548_v46, %s4973_s12 }
  0x43   : > { %3238 = vmatmul.msk.bf16.gmra.mxu0 %vm503_vm0, %v3344_v6 }
  0x53   : > { %3239 = vmatmul.msk.bf16.gmra.mxu0 %vm503_vm0, %v3345_v7 }
  0x63   : > { %3240 = vmatmul.msk.bf16.gmra.mxu0 %vm503_vm0, %v3346_v8 }
  0x73   : > { %3241 = vmatmul.msk.bf16.gmra.mxu0 %vm503_vm0, %v3347_v9 }
  0x83   : > { %3242 = vmatmul.msk.bf16.gmra.mxu0 %vm503_vm0, %v3348_v10 }
  0x93   : > { %3243 = vmatmul.msk.bf16.gmra.mxu0 %vm503_vm0, %v3349_v20 }
  0xa0   : > { %v561_v47 = vpop.f32.mrf.mxu0 }
  0xa1   : > { %v645_v48 = vmul.f32 %v3777_v39, %v561_v47 }
  0xa3   : > { %v681_v49 = vadd.f32 %v3782_v43, %v645_v48  ;;  %3244 = vmatmul.msk.bf16.gmra.mxu0 %vm503_vm0, %v3350_v44 }
  0xa5   : > { %v713_v50 = vmax.f32 %v681_v49, 0.0 }
  0xa7   : > { %v867_v52 = vpack.c.bf16 %v713_v50, %v713_v50 }
  0xa8   : > { %v563_v54 = vpop.f32.mrf.mxu0 }
  0xa9   : > { %v902_v55 = vshrl.u32 %v867_v52, 16  ;;  %v646_v56 = vmul.f32 %v3777_v39, %v563_v54  ;;  %v905_v58 = vshll.u32 %v867_v52, 16 }
  0xab   : > { %v904_v57 = vrot.slane %v902_v55, 7  ;;  %v682_v59 = vadd.f32 %v3782_v43, %v646_v56  ;;  %v1235_v55 = vld [vmem:[#allocation2 + $0x20] sm:$0x1] }
  0xad   : > { %v907_v62 = vor.u32 %v905_v58, %v904_v57  ;;  %v714_v63 = vmax.f32 %v682_v59, 0.0  ;;  %v908_v16 = vrot.slane %v904_v57, 4 }
  0xaf   : > { %v1225_v1 = vsel %vm3798_vm9, %v907_v62, %v1224_v61  ;;  %v868_v2 = vpack.c.bf16 %v714_v63, %v714_v63 }
  0xb0   : > { %1226 = vst [vmem:[#allocation2 + $0xc] sm:$0xf] %v1225_v1  ;;  %v566_v5 = vpop.f32.mrf.mxu0 }
  0xb1   : > { %v910_v6 = vshrl.u32 %v868_v2, 16  ;;  %v647_v7 = vmul.f32 %v3777_v39, %v566_v5  ;;  %v913_v9 = vshll.u32 %v868_v2, 16 }
  0xb3   : > { %v912_v8 = vrot.slane %v910_v6, 7  ;;  %v683_v10 = vadd.f32 %v3782_v43, %v647_v7  ;;  %3245 = vmatmul.msk.bf16.gmra.mxu0 %vm503_vm0, %v3351_v3 }
  0xb5   : > { %v915_v17 = vor.u32 %v913_v9, %v912_v8  ;;  %v917_v18 = vrot.slane %v912_v8, 4  ;;  %v715_v19 = vmax.f32 %v683_v10, 0.0 }
  0xb7   : > { %v916_v20 = vsel %vm3811_vm11, %v908_v16, %v915_v17  ;;  %v1229_v21 = vsel %vm3747_vm4, %v917_v18, %v1228_v13  ;;  %v869_v22 = vpack.c.bf16 %v715_v19, %v715_v19  ;;  %v3510_v34 = vld [vmem:[#allocation2 + $0xc] sm:$0xe]  ;;  %v773_v17 = vsel %vm3747_vm4, 0, %v772_v14 }
  0xb8   : > { %1227 = vst.msk [vmem:[#allocation2 + $0x10] sm:$0xf] %vm745_vm3, %v916_v20  ;;  %v568_v23 = vpop.f32.mrf.mxu0  ;;  %v1238_v20 = vld [vmem:[#allocation2 + $0x24] sm:$0xf] }
  0xb9   : > { %1230 = vst [vmem:[#allocation2 + $0x14] sm:$0x1] %v1229_v21  ;;  %v919_v24 = vshrl.u32 %v869_v22, 16  ;;  %v648_v25 = vmul.f32 %v3777_v39, %v568_v23  ;;  %v922_v29 = vshll.u32 %v869_v22, 16 }
  0xba   : > { %774 = vst [vmem:[#allocation2 + $0x3c] sm:$0x1] %v773_v17 }
  0xbb   : > { %v921_v28 = vrot.slane %v919_v24, 7  ;;  %v684_v30 = vadd.f32 %v3782_v43, %v648_v25  ;;  %v3353_v24 = vld [vmem:[%s3730_s26 + $0x58] sm:$0xff] }
  0xbd   : > { %v924_v32 = vor.u32 %v922_v29, %v921_v28  ;;  %v716_v33 = vmax.f32 %v684_v30, 0.0  ;;  %v925_v54 = vrot.slane %v921_v28, 4  ;;  %v828_v29 = vld [vmem:[#allocation2 + $0x44] sm:$0x1] }
  0xbf   : > { %v1232_v35 = vsel %vm3798_vm9, %v924_v32, %v1231_v31  ;;  %v870_v36 = vpack.c.bf16 %v716_v33, %v716_v33  ;;  %v3829_v37 = vld [vmem:[#allocation2 + $0xc] sm:$0xff]  }
  0xc0   : > { %v3509_v38 = vld [vmem:[#allocation2 + $0xc] sm:$0xf0]  ;;  %1233 = vst [vmem:[#allocation2 + $0x18] sm:$0xf] %v1232_v35  ;;  %v571_v42 = vpop.f32.mrf.mxu0  ;;  %v1373_v44 = vld [vmem:[#allocation2 + $0x14] sm:$0x1]  ;;  %1895 = vrot.lane.b32.xlu1 %v3829_v37, %s4975_s21 }
  0xc1   : > { %v927_v46 = vshrl.u32 %v870_v36, 16  ;;  %v649_v47 = vmul.f32 %v3777_v39, %v571_v42  ;;  %v1505_v48 = vunpack.c.l.b16 %v1373_v44  ;;  %v3511_v49 = vor.u32 %v3510_v34, %v3509_v38 }
  0xc2   : > { %v930_v51 = vshll.u32 %v870_v36, 16  ;;  %v1552_v57 = vshll.u32 %v3829_v37, 16  ;;  %v1550_v63 = vshrl.u32 %v3829_v37, 16  ;;  %v829_v38 = vsel %vm3754_vm6, 0, %v828_v29 }
  0xc3   : > { %v929_v50 = vrot.slane %v927_v46, 7  ;;  %v685_v52 = vadd.f32 %v3782_v43, %v649_v47  ;;  %3246 = vmatmul.msk.bf16.gmra.mxu0 %vm503_vm0, %v3352_v40  ;;  %v1521_v53 = vpack.c.b16 %v1505_v48, %v1505_v48  ;;  %v1813_v56 = vrot.slane %v3511_v49, 1  ;;  %830 = vst [vmem:[#allocation2 + $0x44] sm:$0x1] %v829_v38  ;;  %v1242_v46 = vld [vmem:[#allocation2 + $0x2c] sm:$0x1] }
  0xc4   : > { %v1554_v0 = vrot.slane %v1552_v57, 1 }
  0xc5   : > { %v932_v58 = vor.u32 %v930_v51, %v929_v50  ;;  %v934_v59 = vrot.slane %v929_v50, 4  ;;  %v717_v61 = vmax.f32 %v685_v52, 0.0  ;;  %v1814_v62 = vrot.slane %v1521_v53, 1 }
  0xc6   : > { %v1557_v1 = vshll.u32 %v1521_v53, 16  ;;  %v1555_v7 = vor.u32 %v1554_v0, %v1550_v63 }
  0xc7   : > { %v933_v2 = vsel %vm3811_vm11, %v925_v54, %v932_v58  ;;  %v1236_v3 = vsel %vm3747_vm4, %v934_v59, %v1235_v55  ;;  %v871_v4 = vpack.c.bf16 %v717_v61, %v717_v61  ;;  %v1815_v5 = vsel %vm1809_vm7, %v1813_v56, %v1814_v62  ;;  %v3424_v23 = vld [vmem:[#allocation2 + $0x18] sm:$0xe] }
  0xc8   : > { %1234 = vst.msk [vmem:[#allocation2 + $0x1c] sm:$0xf] %vm745_vm3, %v933_v2  ;;  %1980 = vrot.lane.b32.xlu2 %v1815_v5, %s3604_s25  ;;  %v573_v6 = vpop.f32.mrf.mxu0  ;;  %v1559_v8 = vrot.slane %v1557_v1, 1  ;;  %v775_v2 = vld [vmem:[#allocation2 + $0x48] sm:$0x1] }
  0xc9   : > { %1237 = vst [vmem:[#allocation2 + $0x20] sm:$0x1] %v1236_v3  ;;  %v936_v9 = vshrl.u32 %v871_v4, 16  ;;  %v939_v10 = vshll.u32 %v871_v4, 16  ;;  %v650_v13 = vmul.f32 %v3777_v39, %v573_v6  ;;  %v776_v3 = vsel %vm3747_vm4, 0, %v775_v2 }
  0xca   : > { %v1560_v16 = vsel %vm1536_vm8, %v1555_v7, %v1559_v8  ;;  %777 = vst [vmem:[#allocation2 + $0x48] sm:$0x1] %v776_v3  ;;  %v1245_v7 = vld [vmem:[#allocation2 + $0x30] sm:$0xf] }
  0xcb   : > { %v938_v18 = vrot.slane %v936_v9, 7  ;;  %v686_v19 = vadd.f32 %v3782_v43, %v650_v13  ;;  %1942 = vrot.lane.b32.xlu1 %v1560_v16, %s3605_s28 }
  0xcd   : > { %v941_v21 = vor.u32 %v939_v10, %v938_v18  ;;  %v718_v22 = vmax.f32 %v686_v19, 0.0  ;;  %v942_v45 = vrot.slane %v938_v18, 4  ;;  %v3354_v18 = vld [vmem:[%s3730_s26 + $0x60] sm:$0xff]  ;;  %v831_v19 = vld [vmem:[#allocation2 + $0x50] sm:$0x1] }
  0xcf   : > { %v1239_v25 = vsel %vm3798_vm9, %v941_v21, %v1238_v20  ;;  %v872_v26 = vpack.c.bf16 %v718_v22, %v718_v22  ;;  %v3412_v27 = vld [vmem:[#allocation2 + $0x18] sm:$0xff]   ;;  %v832_v22 = vsel %vm3754_vm6, 0, %v831_v19 }
  0xd0   : > { %v3423_v28 = vld [vmem:[#allocation2 + $0x18] sm:$0xf0]  ;;  %1240 = vst [vmem:[#allocation2 + $0x24] sm:$0xf] %v1239_v25  ;;  %1860 = vrot.lane.b32.xlu2 %v1815_v5, %s3601_s27  ;;  %1897 = vrot.lane.b32.xlu0 %v3412_v27, %s4975_s21  ;;  %v576_v30 = vpop.f32.mrf.mxu0  ;;  %v1374_v31 = vld [vmem:[#allocation2 + $0x20] sm:$0x1] }
  0xd1   : > { %v3425_v32 = vor.u32 %v3424_v23, %v3423_v28  ;;  %v1564_v33 = vshll.u32 %v3412_v27, 16  ;;  %v944_v34 = vshrl.u32 %v872_v26, 16  ;;  %v651_v35 = vmul.f32 %v3777_v39, %v576_v30  ;;  %833 = vst [vmem:[#allocation2 + $0x50] sm:$0x1] %v832_v22 }
  0xd2   : > { %v1506_v36 = vunpack.c.l.b16 %v1374_v31  ;;  %v947_v41 = vshll.u32 %v872_v26, 16  ;;  %v1562_v53 = vshrl.u32 %v3412_v27, 16 }
  0xd3   : > { %v946_v40 = vrot.slane %v944_v34, 7  ;;  %v687_v42 = vadd.f32 %v3782_v43, %v651_v35  ;;  %3247 = vmatmul.msk.bf16.gmra.mxu0 %vm503_vm0, %v3353_v24  ;;  %1731 = vrot.lane.b32.xlu1 %v1560_v16, %s4973_s12  ;;  %v1816_v47 = vrot.slane %v3425_v32, 1  ;;  %v1566_v48 = vrot.slane %v1564_v33, 1  ;;  %v1249_v32 = vld [vmem:[#allocation2 + $0x38] sm:$0x1] }
  0xd4   : > { %v1522_v44 = vpack.c.b16 %v1506_v36, %v1506_v36 }
  0xd5   : > { %v949_v49 = vor.u32 %v947_v41, %v946_v40  ;;  %v951_v50 = vrot.slane %v946_v40, 4  ;;  %v719_v51 = vmax.f32 %v687_v42, 0.0  ;;  %v1567_v1 = vor.u32 %v1566_v48, %v1562_v53  ;;  %v778_v53 = vld [vmem:[#allocation2 + $0x54] sm:$0x1] }
  0xd6   : > { %v1817_v52 = vrot.slane %v1522_v44, 1  ;;  %v1569_v54 = vshll.u32 %v1522_v44, 16 }
  0xd7   : > { %v950_v55 = vsel %vm3811_vm11, %v942_v45, %v949_v49  ;;  %v1243_v56 = vsel %vm3747_vm4, %v951_v50, %v1242_v46  ;;  %v873_v57 = vpack.c.bf16 %v719_v51, %v719_v51  ;;  %v3513_v10 = vld [vmem:[#allocation2 + $0x24] sm:$0xe] }
  0xd8   : > { %v1818_v58 = vsel %vm1809_vm7, %v1816_v47, %v1817_v52  ;;  %1241 = vst.msk [vmem:[#allocation2 + $0x28] sm:$0xf] %vm745_vm3, %v950_v55  ;;  %2017 = vrot.lane.b32.xlu2 %v3412_v27, %s3606_s29  ;;  %v578_v59 = vpop.f32.mrf.mxu0  ;;  %v1571_v61 = vrot.slane %v1569_v54, 1  ;;  %v779_v54 = vsel %vm3747_vm4, 0, %v778_v53 }
  0xd9   : > { %3288 = vmatmul.msk.bf16.vlgmr.msra.gmra.mxu2 %vm2102_vm12, %v1818_v58  ;;  %1244 = vst [vmem:[#allocation2 + $0x2c] sm:$0x1] %v1243_v56  ;;  %v953_v62 = vshrl.u32 %v873_v57, 16  ;;  %v956_v63 = vshll.u32 %v873_v57, 16  ;;  %1862 = vrot.lane.b32.xlu0 %v1818_v58, %s3601_s27  ;;  %v652_v0 = vmul.f32 %v3777_v39, %v578_v59 }
  0xda   : > { %v1572_v6 = vsel %vm1536_vm8, %v1567_v1, %v1571_v61  ;;  %780 = vst [vmem:[#allocation2 + $0x54] sm:$0x1] %v779_v54 }
  0xdb   : > { %v955_v4 = vrot.slane %v953_v62, 7  ;;  %v688_v5 = vadd.f32 %v3782_v43, %v652_v0  ;;  %1944 = vrot.lane.b32.xlu1 %v1572_v6, %s3605_s28 }
  0xdd   : > { %v958_v8 = vor.u32 %v956_v63, %v955_v4  ;;  %v720_v9 = vmax.f32 %v688_v5, 0.0  ;;  %v959_v31 = vrot.slane %v955_v4, 4  ;;  %v3355_v63 = vld [vmem:[%s3730_s26 + $0x68] sm:$0xff]  ;;  %v834_v5 = vld [vmem:[#allocation2 + $0x5c] sm:$0x1] }
  0xdf   : > { %v1246_v13 = vsel %vm3798_vm9, %v958_v8, %v1245_v7  ;;  %v874_v14 = vpack.c.bf16 %v720_v9, %v720_v9  ;;  %v3882_v16 = vld [vmem:[#allocation2 + $0x24] sm:$0xff]  }
  0xe0   : > { %v3512_v17 = vld [vmem:[#allocation2 + $0x24] sm:$0xf0]  ;;  %1247 = vst [vmem:[#allocation2 + $0x30] sm:$0xf] %v1246_v13  ;;  %1982 = vrot.lane.b32.xlu2 %v1818_v58, %s3604_s25  ;;  %v581_v20 = vpop.f32.mrf.mxu0  ;;  %v1375_v21 = vld [vmem:[#allocation2 + $0x2c] sm:$0x1] }
  0xe1   : > { %v961_v23 = vshrl.u32 %v874_v14, 16  ;;  %2064 = vrot.lane.b32.xlu0 %v1572_v6, %s3607_s30  ;;  %v653_v24 = vmul.f32 %v3777_v39, %v581_v20  ;;  %v1507_v25 = vunpack.c.l.b16 %v1375_v21  ;;  %v3514_v26 = vor.u32 %v3513_v10, %v3512_v17  ;;  %v1252_v58 = vld [vmem:[#allocation2 + $0x3c] sm:$0xf] }
  0xe2   : > { %v964_v28 = vshll.u32 %v874_v14, 16  ;;  %v1576_v34 = vshll.u32 %v3882_v16, 16  ;;  %v1574_v48 = vshrl.u32 %v3882_v16, 16  ;;  %v835_v14 = vsel %vm3754_vm6, 0, %v834_v5 }
  0xe3   : > { %v963_v27 = vrot.slane %v961_v23, 7  ;;  %v689_v29 = vadd.f32 %v3782_v43, %v653_v24  ;;  %v1523_v30 = vpack.c.b16 %v1507_v25, %v1507_v25  ;;  %3248 = vmatmul.msk.bf16.gmra.mxu0 %vm503_vm0, %v3354_v18  ;;  %1899 = vrot.lane.b32.xlu1 %v3882_v16, %s4975_s21  ;;  %v1819_v33 = vrot.slane %v3514_v26, 1  ;;  %836 = vst [vmem:[#allocation2 + $0x5c] sm:$0x1] %v835_v14  ;;  %v1256_v23 = vld [vmem:[#allocation2 + $0x44] sm:$0x1] }
  0xe4   : > { %v1578_v41 = vrot.slane %v1576_v34, 1 }
  0xe5   : > { %v966_v35 = vor.u32 %v964_v28, %v963_v27  ;;  %v968_v36 = vrot.slane %v963_v27, 4  ;;  %v721_v38 = vmax.f32 %v689_v29, 0.0  ;;  %v1820_v40 = vrot.slane %v1523_v30, 1 }
  0xe6   : > { %v1581_v49 = vshll.u32 %v1523_v30, 16  ;;  %v1579_v57 = vor.u32 %v1578_v41, %v1574_v48  ;;  %v781_v41 = vld [vmem:[#allocation2 + $0x60] sm:$0x1] }
  0xe7   : > { %v967_v42 = vsel %vm3811_vm11, %v959_v31, %v966_v35  ;;  %v1250_v44 = vsel %vm3747_vm4, %v968_v36, %v1249_v32  ;;  %v875_v45 = vpack.c.bf16 %v721_v38, %v721_v38  ;;  %v1821_v46 = vsel %vm1809_vm7, %v1819_v33, %v1820_v40  ;;  %v3427_v4 = vld [vmem:[#allocation2 + $0x30] sm:$0xe] }
  0xe8   : > { %1248 = vst.msk [vmem:[#allocation2 + $0x34] sm:$0xf] %vm745_vm3, %v967_v42  ;;  %1733 = vrot.lane.b32.xlu2 %v1572_v6, %s4973_s12  ;;  %v583_v47 = vpop.f32.mrf.mxu0  ;;  %v1583_v62 = vrot.slane %v1581_v49, 1 }
  0xe9   : > { %3289 = vmatmul.msk.bf16.gmra.mxu2 %vm2102_vm12, %v1821_v46  ;;  %1251 = vst [vmem:[#allocation2 + $0x38] sm:$0x1] %v1250_v44  ;;  %v970_v50 = vshrl.u32 %v875_v45, 16  ;;  %v973_v51 = vshll.u32 %v875_v45, 16  ;;  %2019 = vrot.lane.b32.xlu0 %v3882_v16, %s3606_s29  ;;  %v654_v52 = vmul.f32 %v3777_v39, %v583_v47  ;;  %v782_v44 = vsel %vm3747_vm4, 0, %v781_v41 }
  0xea   : > { %v1584_v2 = vsel %vm1536_vm8, %v1579_v57, %v1583_v62  ;;  %783 = vst [vmem:[#allocation2 + $0x60] sm:$0x1] %v782_v44  ;;  %v1259_v47 = vld [vmem:[#allocation2 + $0x48] sm:$0xf] }
  0xeb   : > { %v972_v55 = vrot.slane %v970_v50, 7  ;;  %v690_v56 = vadd.f32 %v3782_v43, %v654_v52  ;;  %1864 = vrot.lane.b32.xlu1 %v1821_v46, %s3601_s27 }
  0xed   : > { %v975_v59 = vor.u32 %v973_v51, %v972_v55  ;;  %v722_v61 = vmax.f32 %v690_v56, 0.0  ;;  %v976_v22 = vrot.slane %v972_v55, 4 }
  0xef   : > { %v1253_v0 = vsel %vm3798_vm9, %v975_v59, %v1252_v58  ;;  %v876_v1 = vpack.c.bf16 %v722_v61, %v722_v61  ;;  %v3426_v3 = vld [vmem:[#allocation2 + $0x30] sm:$0xf0]  ;;  %v837_v59 = vld [vmem:[#allocation2 + $0x68] sm:$0x1] }
  0xf0   : > { %1254 = vst [vmem:[#allocation2 + $0x3c] sm:$0xf] %v1253_v0  ;;  %1946 = vrot.lane.b32.xlu2 %v1584_v2, %s3605_s28  ;;  %v586_v6 = vpop.f32.mrf.mxu0  ;;  %v1376_v7 = vld [vmem:[#allocation2 + $0x38] sm:$0x1]  ;;  %v3428_v8 = vor.u32 %v3427_v4, %v3426_v3  ;;  %v3413_v21 = vld [vmem:[#allocation2 + $0x30] sm:$0xff]   ;;  %v838_v0 = vsel %vm3754_vm6, 0, %v837_v59 }
  0xf1   : > { %v978_v9 = vshrl.u32 %v876_v1, 16  ;;  %1984 = vrot.lane.b32.xlu0 %v1821_v46, %s3604_s25  ;;  %v655_v10 = vmul.f32 %v3777_v39, %v586_v6  ;;  %v1508_v13 = vunpack.c.l.b16 %v1376_v7  ;;  %v981_v18 = vshll.u32 %v876_v1, 16  ;;  %v3356_v58 = vld [vmem:[%s3730_s26 + $0x70] sm:$0xff]  ;;  %839 = vst [vmem:[#allocation2 + $0x68] sm:$0x1] %v838_v0 }
  0xf2   : > { %v1822_v24 = vrot.slane %v3428_v8, 1  ;;  %v1588_v29 = vshll.u32 %v3413_v21, 16  ;;  %v1586_v48 = vshrl.u32 %v3413_v21, 16 }
  0xf3   : > { %v980_v17 = vrot.slane %v978_v9, 7  ;;  %v691_v19 = vadd.f32 %v3782_v43, %v655_v10  ;;  %v1524_v20 = vpack.c.b16 %v1508_v13, %v1508_v13  ;;  %3249 = vmatmul.msk.bf16.gmra.mxu0 %vm503_vm0, %v3355_v63  ;;  %2066 = vrot.lane.b32.xlu1 %v1584_v2, %s3607_s30  ;;  %v1263_v10 = vld [vmem:[#allocation2 + $0x50] sm:$0x1] }
  0xf4   : > { %v1590_v42 = vrot.slane %v1588_v29, 1  ;;  %v784_v29 = vld [vmem:[#allocation2 + $0x6c] sm:$0x1] }
  0xf5   : > { %v983_v25 = vor.u32 %v981_v18, %v980_v17  ;;  %v985_v26 = vrot.slane %v980_v17, 4  ;;  %v723_v27 = vmax.f32 %v691_v19, 0.0  ;;  %v1823_v28 = vrot.slane %v1524_v20, 1 }
  0xf6   : > { %v1593_v35 = vshll.u32 %v1524_v20, 16  ;;  %v1591_v53 = vor.u32 %v1590_v42, %v1586_v48  ;;  %v840_v48 = vld [vmem:[#allocation2 + $0x74] sm:$0x1] }
  0xf7   : > { %v984_v30 = vsel %vm3811_vm11, %v976_v22, %v983_v25  ;;  %v1257_v31 = vsel %vm3747_vm4, %v985_v26, %v1256_v23  ;;  %v877_v32 = vpack.c.bf16 %v723_v27, %v723_v27  ;;  %v1824_v33 = vsel %vm1809_vm7, %v1822_v24, %v1823_v28  ;;  %v3516_v50 = vld [vmem:[#allocation2 + $0x3c] sm:$0xe] }
  0xf8   : > { %1255 = vst.msk [vmem:[#allocation2 + $0x40] sm:$0xf] %vm745_vm3, %v984_v30  ;;  %1901 = vrot.lane.b32.xlu2 %v3413_v21, %s4975_s21  ;;  %v588_v34 = vpop.f32.mrf.mxu0  ;;  %v1595_v49 = vrot.slane %v1593_v35, 1 }
  0xf9   : > { %3290 = vmatmul.msk.bf16.gmra.mxu2 %vm2102_vm12, %v1824_v33  ;;  %1258 = vst [vmem:[#allocation2 + $0x44] sm:$0x1] %v1257_v31  ;;  %v987_v36 = vshrl.u32 %v877_v32, 16  ;;  %v990_v38 = vshll.u32 %v877_v32, 16  ;;  %1735 = vrot.lane.b32.xlu0 %v1584_v2, %s4973_s12  ;;  %v656_v40 = vmul.f32 %v3777_v39, %v588_v34  ;;  %v785_v31 = vsel %vm3747_vm4, 0, %v784_v29 }
  0xfa   : > { %v1596_v61 = vsel %vm1536_vm8, %v1591_v53, %v1595_v49  ;;  %786 = vst [vmem:[#allocation2 + $0x6c] sm:$0x1] %v785_v31  ;;  %v1266_v34 = vld [vmem:[#allocation2 + $0x54] sm:$0xf]  ;;  %v3367_v31 = vld [vmem:[%s4966_s4 + $0x28] sm:$0xff] }
  0xfb   : > { %v989_v45 = vrot.slane %v987_v36, 7  ;;  %v692_v46 = vadd.f32 %v3782_v43, %v656_v40  ;;  %2021 = vrot.lane.b32.xlu1 %v3413_v21, %s3606_s29 }
  0xfd   : > { %v992_v51 = vor.u32 %v990_v38, %v989_v45  ;;  %v724_v52 = vmax.f32 %v692_v46, 0.0  ;;  %v993_v6 = vrot.slane %v989_v45, 4 }
  0xff   : > { %v1260_v54 = vsel %vm3798_vm9, %v992_v51, %v1259_v47  ;;  %v878_v55 = vpack.c.bf16 %v724_v52, %v724_v52  ;;  %v3939_v56 = vld [vmem:[#allocation2 + $0x3c] sm:$0xff]  }
 0x100   : > { %v3515_v57 = vld [vmem:[#allocation2 + $0x3c] sm:$0xf0]  ;;  %1261 = vst [vmem:[#allocation2 + $0x48] sm:$0xf] %v1260_v54  ;;  %1866 = vrot.lane.b32.xlu2 %v1824_v33, %s3601_s27  ;;  %v591_v62 = vpop.f32.mrf.mxu0  ;;  %v1377_v63 = vld [vmem:[#allocation2 + $0x44] sm:$0x1] }
 0x101   : > { %v995_v1 = vshrl.u32 %v878_v55, 16  ;;  %v998_v2 = vshll.u32 %v878_v55, 16  ;;  %1948 = vrot.lane.b32.xlu0 %v1596_v61, %s3605_s28  ;;  %v657_v3 = vmul.f32 %v3777_v39, %v591_v62  ;;  %v1509_v4 = vunpack.c.l.b16 %v1377_v63  ;;  %v3357_v47 = vld [vmem:[%s3730_s26 + $0x78] sm:$0xff] }
 0x102   : > { %v3517_v5 = vor.u32 %v3516_v50, %v3515_v57  ;;  %v1600_v20 = vshll.u32 %v3939_v56, 16  ;;  %v1598_v35 = vshrl.u32 %v3939_v56, 16 }
 0x103   : > { %v997_v7 = vrot.slane %v995_v1, 7  ;;  %v693_v8 = vadd.f32 %v3782_v43, %v657_v3  ;;  %v1525_v9 = vpack.c.b16 %v1509_v4, %v1509_v4  ;;  %3250 = vmatmul.msk.bf16.gmra.mxu0 %vm503_vm0, %v3356_v58  ;;  %1986 = vrot.lane.b32.xlu1 %v1824_v33, %s3604_s25 }
 0x104   : > { %v1825_v13 = vrot.slane %v3517_v5, 1  ;;  %v1602_v30 = vrot.slane %v1600_v20, 1 }
 0x105   : > { %v1000_v14 = vor.u32 %v998_v2, %v997_v7  ;;  %v1002_v17 = vrot.slane %v997_v7, 4  ;;  %v725_v18 = vmax.f32 %v693_v8, 0.0  ;;  %v1826_v19 = vrot.slane %v1525_v9, 1  ;;  %v1270_v2 = vld [vmem:[#allocation2 + $0x5c] sm:$0x1] }
 0x106   : > { %v1605_v36 = vshll.u32 %v1525_v9, 16  ;;  %v1603_v42 = vor.u32 %v1602_v30, %v1598_v35  ;;  %v3369_v7 = vld [vmem:[%s4966_s4 + $0x38] sm:$0xff] }
 0x107   : > { %v1001_v21 = vsel %vm3811_vm11, %v993_v6, %v1000_v14  ;;  %v1264_v22 = vsel %vm3747_vm4, %v1002_v17, %v1263_v10  ;;  %v879_v23 = vpack.c.bf16 %v725_v18, %v725_v18  ;;  %v3957_v24 = vsel %vm1809_vm7, %v1825_v13, %v1826_v19  ;;  %v3430_v41 = vld [vmem:[#allocation2 + $0x48] sm:$0xe]  ;;  %2468 = vmatpush.bf16.msra.mxu1 %v3369_v7 }
 0x108   : > { %1262 = vst.msk [vmem:[#allocation2 + $0x4c] sm:$0xf] %vm745_vm3, %v1001_v21  ;;  %2068 = vrot.lane.b32.xlu2 %v1596_v61, %s3607_s30  ;;  %v593_v25 = vpop.f32.mrf.mxu0  ;;  %v1607_v50 = vrot.slane %v1605_v36, 1  ;;  %v787_v21 = vld [vmem:[#allocation2 + $0x78] sm:$0x1] }
 0x109   : > { %3291 = vmatmul.msk.bf16.gmra.mxu2 %vm2102_vm12, %v3957_v24  ;;  %1265 = vst [vmem:[#allocation2 + $0x50] sm:$0x1] %v1264_v22  ;;  %v1004_v26 = vshrl.u32 %v879_v23, 16  ;;  %v1007_v27 = vshll.u32 %v879_v23, 16  ;;  %1903 = vrot.lane.b32.xlu0 %v3939_v56, %s4975_s21  ;;  %v658_v28 = vmul.f32 %v3777_v39, %v593_v25  ;;  %v788_v23 = vsel %vm3747_vm4, 0, %v787_v21  ;;  %v3364_v21 = vld [vmem:[%s4966_s4 + $0x10] sm:$0xff] }
 0x10a   : > { %v1608_v59 = vsel %vm1536_vm8, %v1603_v42, %v1607_v50  ;;  %789 = vst [vmem:[#allocation2 + $0x78] sm:$0x1] %v788_v23  ;;  %v3366_v50 = vld [vmem:[%s4966_s4 + $0x20] sm:$0xff] }
 0x10b   : > { %v1006_v32 = vrot.slane %v1004_v26, 7  ;;  %v694_v33 = vadd.f32 %v3782_v43, %v658_v28  ;;  %1737 = vrot.lane.b32.xlu1 %v1596_v61, %s4973_s12  ;;  %v841_v61 = vsel %vm3754_vm6, 0, %v840_v48  ;;  %v1273_v28 = vld [vmem:[#allocation2 + $0x60] sm:$0xf] }
 0x10c   : > { %842 = vst [vmem:[#allocation2 + $0x74] sm:$0x1] %v841_v61  ;;  %v1277_v61 = vld [vmem:[#allocation2 + $0x68] sm:$0x1] }
 0x10d   : > { %v1009_v38 = vor.u32 %v1007_v27, %v1006_v32  ;;  %v726_v40 = vmax.f32 %v694_v33, 0.0  ;;  %v1010_v58 = vrot.slane %v1006_v32, 4 }
 0x10f   : > { %v1267_v44 = vsel %vm3798_vm9, %v1009_v38, %v1266_v34  ;;  %v880_v45 = vpack.c.bf16 %v726_v40, %v726_v40  ;;  %v3429_v46 = vld [vmem:[#allocation2 + $0x48] sm:$0xf0] }
 0x110   : > { %1268 = vst [vmem:[#allocation2 + $0x54] sm:$0xf] %v1267_v44  ;;  %2023 = vrot.lane.b32.xlu2 %v3939_v56, %s3606_s29  ;;  %v596_v49 = vpop.f32.mrf.mxu0  ;;  %v1378_v51 = vld [vmem:[#allocation2 + $0x50] sm:$0x1]  ;;  %v3431_v52 = vor.u32 %v3430_v41, %v3429_v46  ;;  %v3414_v14 = vld [vmem:[#allocation2 + $0x48] sm:$0xff]  }
 0x111   : > { %v1012_v53 = vshrl.u32 %v880_v45, 16  ;;  %v1015_v54 = vshll.u32 %v880_v45, 16  ;;  %1868 = vrot.lane.b32.xlu0 %v3957_v24, %s3601_s27  ;;  %v659_v55 = vmul.f32 %v3777_v39, %v596_v49  ;;  %v1510_v57 = vunpack.c.l.b16 %v1378_v51  ;;  %v843_v41 = vld [vmem:[#allocation2 + $0x80] sm:$0x1] }
 0x112   : > { %v1828_v1 = vrot.slane %v3431_v52, 1  ;;  %v1612_v22 = vshll.u32 %v3414_v14, 16  ;;  %v1610_v32 = vshrl.u32 %v3414_v14, 16  ;;  %v844_v45 = vsel %vm3754_vm6, 0, %v843_v41 }
 0x113   : > { %v1014_v62 = vrot.slane %v1012_v53, 7  ;;  %v695_v63 = vadd.f32 %v3782_v43, %v659_v55  ;;  %v3983_v0 = vpack.c.b16 %v1510_v57, %v1510_v57  ;;  %3251 = vmatmul.msk.bf16.gmra.mxu0 %vm503_vm0, %v3357_v47  ;;  %1950 = vrot.lane.b32.xlu1 %v1608_v59, %s3605_s28  ;;  %845 = vst [vmem:[#allocation2 + $0x80] sm:$0x1] %v844_v45 }
 0x114   : > { %v1614_v33 = vrot.slane %v1612_v22, 1 }
 0x115   : > { %v1017_v3 = vor.u32 %v1015_v54, %v1014_v62  ;;  %v1019_v4 = vrot.slane %v1014_v62, 4  ;;  %v727_v5 = vmax.f32 %v695_v63, 0.0  ;;  %v1829_v6 = vrot.slane %v3983_v0, 1 }
 0x116   : > { %v1617_v34 = vshll.u32 %v3983_v0, 16  ;;  %v1615_v52 = vor.u32 %v1614_v33, %v1610_v32  ;;  %v4071_v33 = vpop.permute.xlu0 %1858 }
 0x117   : > { %v1018_v8 = vsel %vm3811_vm11, %v1010_v58, %v1017_v3  ;;  %v1271_v9 = vsel %vm3747_vm4, %v1019_v4, %v1270_v2  ;;  %v881_v10 = vpack.c.bf16 %v727_v5, %v727_v5  ;;  %v3996_v13 = vsel %vm1809_vm7, %v1828_v1, %v1829_v6  ;;  %v3570_v27 = vld [vmem:[#allocation2 + $0x54] sm:$0xe]  ;;  %v3365_v3 = vld [vmem:[%s4966_s4 + $0x18] sm:$0xff] }
 0x118   : > { %1269 = vst.msk [vmem:[#allocation2 + $0x58] sm:$0xf] %vm745_vm3, %v1018_v8  ;;  %1988 = vrot.lane.b32.xlu2 %v3957_v24, %s3604_s25  ;;  %v598_v17 = vpop.f32.mrf.mxu0  ;;  %v3368_v24 = vld [vmem:[%s4966_s4 + $0x30] sm:$0xff]  ;;  %v1619_v53 = vrot.slane %v1617_v34, 1 }
 0x119   : > { %3292 = vmatmul.msk.bf16.gmra.mxu2 %vm2102_vm12, %v3996_v13  ;;  %1272 = vst [vmem:[#allocation2 + $0x5c] sm:$0x1] %v1271_v9  ;;  %v1021_v18 = vshrl.u32 %v881_v10, 16  ;;  %v1024_v19 = vshll.u32 %v881_v10, 16  ;;  %2070 = vrot.lane.b32.xlu0 %v1608_v59, %s3607_s30  ;;  %v660_v20 = vmul.f32 %v3777_v39, %v598_v17 }
 0x11a   : > { %2469 = vmatpush.bf16.msra.mxu1 %v3368_v24  ;;  %v1620_v4 = vsel %vm1536_vm8, %v1615_v52, %v1619_v53  ;;  %v4092_v53 = vld [vmem:[%s4965_s3] ss:$0 sm:$0xff] }
 0x11b   : > { %v1023_v25 = vrot.slane %v1021_v18, 7  ;;  %v696_v26 = vadd.f32 %v3782_v43, %v660_v20  ;;  %1905 = vrot.lane.b32.xlu1 %v3414_v14, %s4975_s21  ;;  %v790_v18 = vld [vmem:[#allocation2 + $0x84] sm:$0x1] }
 0x11c   : > { %v791_v20 = vsel %vm3747_vm4, 0, %v790_v18  ;;  %v793_v18 = vld [vmem:[#allocation2 + $0x90] sm:$0x1] }
 0x11d   : > { %v1026_v29 = vor.u32 %v1024_v19, %v1023_v25  ;;  %v728_v30 = vmax.f32 %v696_v26, 0.0  ;;  %v1027_v55 = vrot.slane %v1023_v25, 4  ;;  %792 = vst [vmem:[#allocation2 + $0x84] sm:$0x1] %v791_v20 }
 0x11e   : > { %2470 = vmatpush.bf16.msra.mxu1 %v3367_v31  ;;  %v1730_v20 = vpop.permute.xlu0 %1729 }
 0x11f   : > { %v1274_v35 = vsel %vm3798_vm9, %v1026_v29, %v1273_v28  ;;  %v882_v36 = vpack.c.bf16 %v728_v30, %v728_v30  ;;  %v4018_v38 = vld [vmem:[#allocation2 + $0x54] sm:$0xff]  }
 0x120   : > { %v3569_v40 = vld [vmem:[#allocation2 + $0x54] sm:$0xf0]  ;;  %1275 = vst [vmem:[#allocation2 + $0x60] sm:$0xf] %v1274_v35  ;;  %1739 = vrot.lane.b32.xlu2 %v1608_v59, %s4973_s12  ;;  %v601_v42 = vpop.f32.mrf.mxu0  ;;  %v1379_v44 = vld [vmem:[#allocation2 + $0x5c] sm:$0x1] }
 0x121   : > { %v1029_v46 = vshrl.u32 %v882_v36, 16  ;;  %v1032_v47 = vshll.u32 %v882_v36, 16  ;;  %2025 = vrot.lane.b32.xlu0 %v3414_v14, %s3606_s29  ;;  %v661_v48 = vmul.f32 %v3777_v39, %v601_v42  ;;  %v1511_v49 = vunpack.c.l.b16 %v1379_v44  ;;  %v4079_v44 = vld [vmem:[%s4964_s2] ss:$0 sm:$0xff] }
 0x122   : > { %v4028_v51 = vpop.permute.xlu2 %1980  ;;  %v3571_v54 = vor.u32 %v3570_v27, %v3569_v40  ;;  %2471 = vmatpush.bf16.msra.mxu1 %v3366_v50  ;;  %v1624_v24 = vshll.u32 %v4018_v38, 16  ;;  %v3363_v27 = vld [vmem:[%s4966_s4 + $0x8] sm:$0xff]  ;;  %v1622_v28 = vshrl.u32 %v4018_v38, 16 }
 0x123   : > { %v1031_v57 = vrot.slane %v1029_v46, 7  ;;  %v697_v58 = vadd.f32 %v3782_v43, %v661_v48  ;;  %v4031_v59 = vpack.c.b16 %v1511_v49, %v1511_v49  ;;  %1870 = vrot.lane.b32.xlu1 %v3996_v13, %s3601_s27  ;;  %v846_v40 = vld [vmem:[#allocation2 + $0x8c] sm:$0x1] }
 0x124   : > { %v1831_v62 = vrot.slane %v3571_v54, 1  ;;  %v1626_v31 = vrot.slane %v1624_v24, 1  ;;  %v847_v49 = vsel %vm3754_vm6, 0, %v846_v40  ;;  %v849_v40 = vld [vmem:[#allocation2 + $0x98] sm:$0x1] }
 0x125   : > { %v1034_v63 = vor.u32 %v1032_v47, %v1031_v57  ;;  %v1036_v0 = vrot.slane %v1031_v57, 4  ;;  %v729_v1 = vmax.f32 %v697_v58, 0.0  ;;  %v1832_v2 = vrot.slane %v4031_v59, 1  ;;  %v3362_v47 = vld [vmem:[%s4966_s4] sm:$0xff]  ;;  %848 = vst [vmem:[#allocation2 + $0x8c] sm:$0x1] %v847_v49 }
 0x126   : > { %2472 = vmatpush.bf16.msra.mxu1 %v3365_v3  ;;  %v1629_v32 = vshll.u32 %v4031_v59, 16  ;;  %v1284_v57 = vld [vmem:[#allocation2 + $0x74] sm:$0x1]  ;;  %v1627_v59 = vor.u32 %v1626_v31, %v1622_v28 }
 0x127   : > { %v1035_v5 = vsel %vm3811_vm11, %v1027_v55, %v1034_v63  ;;  %v1278_v6 = vsel %vm3747_vm4, %v1036_v0, %v1277_v61  ;;  %v883_v7 = vpack.c.bf16 %v729_v1, %v729_v1  ;;  %v4045_v8 = vsel %vm1809_vm7, %v1831_v62, %v1832_v2  ;;  %v3433_v26 = vld [vmem:[#allocation2 + $0x60] sm:$0xe] }
 0x128   : > { %1276 = vst.msk [vmem:[#allocation2 + $0x64] sm:$0xf] %vm745_vm3, %v1035_v5  ;;  %1952 = vrot.lane.b32.xlu2 %v1620_v4, %s3605_s28  ;;  %v603_v9 = vpop.f32.mrf.mxu0  ;;  %v1631_v61 = vrot.slane %v1629_v32, 1 }
 0x129   : > { %3293 = vmatmul.msk.bf16.gmra.mxu2 %vm2102_vm12, %v4045_v8  ;;  %1279 = vst [vmem:[#allocation2 + $0x68] sm:$0x1] %v1278_v6  ;;  %v1038_v10 = vshrl.u32 %v883_v7, 16  ;;  %v1041_v14 = vshll.u32 %v883_v7, 16  ;;  %1990 = vrot.lane.b32.xlu0 %v3996_v13, %s3604_s25  ;;  %v662_v17 = vmul.f32 %v3777_v39, %v603_v9  ;;  %v1280_v13 = vld [vmem:[#allocation2 + $0x6c] sm:$0xf] }
 0x12a   : > { %v4054_v19 = vpop.permute.xlu2 %1860  ;;  %2473 = vmatpush.bf16.msra.mxu1 %v3364_v21  ;;  %v1632_v7 = vsel %vm1536_vm8, %v1627_v59, %v1631_v61 }
 0x12b   : > { %v1040_v22 = vrot.slane %v1038_v10, 7  ;;  %v698_v23 = vadd.f32 %v3782_v43, %v662_v17  ;;  %2072 = vrot.lane.b32.xlu1 %v1620_v4, %s3607_s30 }
 0x12d   : > { %v1043_v39 = vor.u32 %v1041_v14, %v1040_v22  ;;  %v730_v25 = vmax.f32 %v698_v23, 0.0  ;;  %v1044_v50 = vrot.slane %v1040_v22, 4  ;;  %v794_v22 = vsel %vm3747_vm4, 0, %v793_v18 }
 0x12e   : > { %2474 = vmatpush.bf16.msra.mxu1 %v3363_v27  ;;  %795 = vst [vmem:[#allocation2 + $0x90] sm:$0x1] %v794_v22 }
 0x12f   : > { %v1281_v29 = vsel %vm3798_vm9, %v1043_v39, %v1280_v13  ;;  %v884_v43 = vpack.c.bf16 %v730_v25, %v730_v25  ;;  %v3432_v30 = vld [vmem:[#allocation2 + $0x60] sm:$0xf0]  ;;  %v1287_v25 = vld [vmem:[#allocation2 + $0x78] sm:$0xf] }
 0x130   : > { %1282 = vst [vmem:[#allocation2 + $0x6c] sm:$0xf] %v1281_v29  ;;  %1907 = vrot.lane.b32.xlu2 %v4018_v38, %s4975_s21  ;;  %v606_v34 = vpop.f32.mrf.mxu0  ;;  %v1380_v35 = vld [vmem:[#allocation2 + $0x68] sm:$0x1]  ;;  %v3434_v36 = vor.u32 %v3433_v26, %v3432_v30  ;;  %v3415_v13 = vld [vmem:[#allocation2 + $0x60] sm:$0xff]   ;;  %s4988_s21 = smov 16  }
 0x131   : > { %v1046_v41 = vshrl.u32 %v884_v43, 16  ;;  %v1049_v42 = vshll.u32 %v884_v43, 16  ;;  %1741 = vrot.lane.b32.xlu0 %v1620_v4, %s4973_s12  ;;  %v663_v45 = vmul.f32 %v4079_v44, %v606_v34  ;;  %v1512_v46 = vunpack.c.l.b16 %v1380_v35  ;;  %s4987_s12 = smov 48  }
 0x132   : > { %v4085_v48 = vpop.permute.xlu2 %2017  ;;  %v1834_v58 = vrot.slane %v3434_v36, 1  ;;  %2475 = vmatpush.bf16.msra.mxu1 %v3362_v47  ;;  %v4100_v2 = vpop.permute.xlu1 %1895  ;;  %v1636_v29 = vshll.u32 %v3415_v13, 16  ;;  %v1634_v34 = vshrl.u32 %v3415_v13, 16 }
 0x133   : > { %v1048_v52 = vrot.slane %v1046_v41, 7  ;;  %v699_v54 = vadd.f32 %v4092_v53, %v663_v45  ;;  %v4095_v55 = vpack.c.b16 %v1512_v46, %v1512_v46  ;;  %2027 = vrot.lane.b32.xlu1 %v4018_v38, %s3606_s29 }
 0x135   : > { %v1051_v62 = vor.u32 %v1049_v42, %v1048_v52  ;;  %v1053_v63 = vrot.slane %v1048_v52, 4  ;;  %v731_v0 = vmax.f32 %v699_v54, 0.0  ;;  %v1835_v1 = vrot.slane %v4095_v55, 1 }
 0x136   : > { %v1641_v52 = vshll.u32 %v4095_v55, 16  ;;  %v850_v54 = vsel %vm3754_vm6, 0, %v849_v40  ;;  %v3504_v55 = vld [vmem:[#allocation2] sm:$0xff]  }
 0x137   : > { %v1052_v3 = vsel %vm3811_vm11, %v1044_v50, %v1051_v62  ;;  %v1285_v4 = vsel %vm3747_vm4, %v1053_v63, %v1284_v57  ;;  %v885_v5 = vpack.c.bf16 %v731_v0, %v731_v0  ;;  %v4110_v6 = vsel %vm1809_vm7, %v1834_v58, %v1835_v1  ;;  %v3573_v39 = vld [vmem:[#allocation2 + $0x6c] sm:$0xe]  ;;  %851 = vst [vmem:[#allocation2 + $0x98] sm:$0x1] %v850_v54  ;;  %v1291_v62 = vld [vmem:[#allocation2 + $0x80] sm:$0x1] }
 0x138   : > { %1283 = vst.msk [vmem:[#allocation2 + $0x70] sm:$0xf] %vm745_vm3, %v1052_v3  ;;  %1872 = vrot.lane.b32.xlu2 %v4045_v8, %s3601_s27  ;;  %v608_v9 = vpop.f32.mrf.mxu0  ;;  %v1638_v50 = vrot.slane %v1636_v29, 1  ;;  %v1643_v18 = vrot.slane %v1641_v52, 1  ;;  %v852_v54 = vld [vmem:[#allocation2 + $0xa4] sm:$0x1] }
 0x139   : > { %1286 = vst [vmem:[#allocation2 + $0x74] sm:$0x1] %v1285_v4  ;;  %v1055_v10 = vshrl.u32 %v885_v5, 16  ;;  %v1058_v14 = vshll.u32 %v885_v5, 16  ;;  %3294 = vmatmul.msk.bf16.gmra.mxu2 %vm2102_vm12, %v4110_v6  ;;  %1954 = vrot.lane.b32.xlu0 %v1632_v7, %s3605_s28  ;;  %v664_v17 = vmul.f32 %v4079_v44, %v608_v9  ;;  %v2104_v5 = vsel %vm2102_vm12, %v3504_v55, %v1730_v20 }
 0x13a   : > { %v4117_v21 = vpop.permute.xlu2 %1982 }
 0x13b   : > { %v1057_v23 = vrot.slane %v1055_v10, 7  ;;  %v700_v24 = vadd.f32 %v4092_v53, %v664_v17  ;;  %1992 = vrot.lane.b32.xlu1 %v4045_v8, %s3604_s25  ;;  %v1639_v10 = vor.u32 %v1638_v50, %v1634_v34 }
 0x13d   : > { %v1060_v26 = vor.u32 %v1058_v14, %v1057_v23  ;;  %v732_v27 = vmax.f32 %v700_v24, 0.0  ;;  %v4124_v28 = vpop.permute.xlu1 %1942  ;;  %v1061_v57 = vrot.slane %v1057_v23, 4  ;;  %v1644_v34 = vsel %vm1536_vm8, %v1639_v10, %v1643_v18  ;;  %v1298_v10 = vld [vmem:[#allocation2 + $0x8c] sm:$0x1] }
 0x13f   : > { %v1288_v43 = vsel %vm3798_vm9, %v1060_v26, %v1287_v25  ;;  %v886_v30 = vpack.c.bf16 %v732_v27, %v732_v27  ;;  %v4128_v31 = vld [vmem:[#allocation2 + $0x6c] sm:$0xff]   ;;  %v796_v25 = vld [vmem:[#allocation2 + $0x9c] sm:$0x1]  ;;  %v2137_v26 = vsel %vm2135_vm13, %v2104_v5, %v4071_v33 }
 0x140   : > { %v3572_v32 = vld [vmem:[#allocation2 + $0x6c] sm:$0xf0]  ;;  %1289 = vst [vmem:[#allocation2 + $0x78] sm:$0xf] %v1288_v43  ;;  %2074 = vrot.lane.b32.xlu2 %v1632_v7, %s3607_s30  ;;  %v611_v35 = vpop.f32.mrf.mxu0  ;;  %v1381_v36 = vld [vmem:[#allocation2 + $0x74] sm:$0x1]  ;;  %v2170_v29 = vsel %vm2168_vm14, %v2137_v26, %v4100_v2 }
 0x141   : > { %v1063_v8 = vshrl.u32 %v886_v30, 16  ;;  %v1066_v41 = vshll.u32 %v886_v30, 16  ;;  %1909 = vrot.lane.b32.xlu0 %v3415_v13, %s4987_s12  ;;  %v665_v42 = vmul.f32 %v4079_v44, %v611_v35  ;;  %v1513_v45 = vunpack.c.l.b16 %v1381_v36  ;;  %v1294_v35 = vld [vmem:[#allocation2 + $0x84] sm:$0xf] }
 0x142   : > { %v4133_v46 = vpop.permute.xlu2 %1733  ;;  %v4135_v47 = vpop.permute.xlu0 %1897  ;;  %v3574_v49 = vor.u32 %v3573_v39, %v3572_v32  ;;  %v797_v27 = vsel %vm3747_vm4, 0, %v796_v25  ;;  %v2202_v33 = vsel %vm503_vm0, %v2170_v29, %v4124_v28 }
 0x143   : > { %v1065_v58 = vrot.slane %v1063_v8, 7  ;;  %v701_v59 = vadd.f32 %v4092_v53, %v665_v42  ;;  %v4141_v61 = vpack.c.b16 %v1513_v45, %v1513_v45  ;;  %1743 = vrot.lane.b32.xlu1 %v1632_v7, %s4988_s21  ;;  %798 = vst [vmem:[#allocation2 + $0x9c] sm:$0x1] %v797_v27  ;;  %v2235_v2 = vsel %vm2233_vm15, %v2202_v33, %v4028_v51 }
 0x144   : > { %v1837_v63 = vrot.slane %v3574_v49, 1 }
 0x145   : > { %v1068_v0 = vor.u32 %v1066_v41, %v1065_v58  ;;  %v1070_v1 = vrot.slane %v1065_v58, 4  ;;  %v733_v3 = vmax.f32 %v701_v59, 0.0  ;;  %v1838_v4 = vrot.slane %v4141_v61, 1  ;;  %v4146_v9 = vpop.permute.xlu1 %1731 }
 0x146   : > { %v1653_v29 = vshll.u32 %v4141_v61, 16  ;;  %v2106_v33 = vsel %vm2102_vm12, %v3829_v37, %v4146_v9 }
 0x147   : > { %v1069_v14 = vsel %vm3811_vm11, %v1061_v57, %v1068_v0  ;;  %v1292_v17 = vsel %vm3747_vm4, %v1070_v1, %v1291_v62  ;;  %v887_v7 = vpack.c.bf16 %v733_v3, %v733_v3  ;;  %v4155_v22 = vsel %vm1809_vm7, %v1837_v63, %v1838_v4  ;;  %v3436_v8 = vld [vmem:[#allocation2 + $0x78] sm:$0xe] }
 0x148   : > { %1290 = vst.msk [vmem:[#allocation2 + $0x7c] sm:$0xf] %vm745_vm3, %v1069_v14  ;;  %2029 = vrot.lane.b32.xlu2 %v3415_v13, %s3606_s29  ;;  %v613_v20 = vpop.f32.mrf.mxu0  ;;  %v2268_v63 = vsel %vm2266_vm1, %v2235_v2, %v4085_v48  ;;  %v1648_v0 = vshll.u32 %v4128_v31, 16  ;;  %v1655_v9 = vrot.slane %v1653_v29, 1 }
 0x149   : > { %1293 = vst [vmem:[#allocation2 + $0x80] sm:$0x1] %v1292_v17  ;;  %v1072_v23 = vshrl.u32 %v887_v7, 16  ;;  %v1075_v24 = vshll.u32 %v887_v7, 16  ;;  %3295 = vmatmul.msk.bf16.gmra.mxu2 %vm2102_vm12, %v4155_v22  ;;  %1874 = vrot.lane.b32.xlu0 %v4110_v6, %s3601_s27  ;;  %v666_v39 = vmul.f32 %v4079_v44, %v613_v20 }
 0x14a   : > { %v4164_v13 = vpop.permute.xlu2 %1946 }
 0x14b   : > { %v1074_v43 = vrot.slane %v1072_v23, 7  ;;  %v4170_v30 = vpop.permute.xlu0 %1862  ;;  %v702_v32 = vadd.f32 %v4092_v53, %v666_v39  ;;  %1956 = vrot.lane.b32.xlu1 %v1644_v34, %s3605_s28  ;;  %v1650_v39 = vrot.slane %v1648_v0, 1 }
 0x14d   : > { %v1077_v36 = vor.u32 %v1075_v24, %v1074_v43  ;;  %v734_v40 = vmax.f32 %v702_v32, 0.0  ;;  %v4177_v41 = vpop.permute.xlu1 %1944  ;;  %v1078_v1 = vrot.slane %v1074_v43, 4  ;;  %v1646_v24 = vshrl.u32 %v4128_v31, 16 }
 0x14f   : > { %v1295_v42 = vsel %vm3798_vm9, %v1077_v36, %v1294_v35  ;;  %v888_v45 = vpack.c.bf16 %v734_v40, %v734_v40  ;;  %v3435_v49 = vld [vmem:[#allocation2 + $0x78] sm:$0xf0]  ;;  %v1651_v37 = vor.u32 %v1650_v39, %v1646_v24 }
 0x150   : > { %1296 = vst [vmem:[#allocation2 + $0x84] sm:$0xf] %v1295_v42  ;;  %1994 = vrot.lane.b32.xlu2 %v4110_v6, %s3604_s25  ;;  %v616_v28 = vpop.f32.mrf.mxu0  ;;  %v1382_v50 = vld [vmem:[#allocation2 + $0x80] sm:$0x1]  ;;  %v3437_v52 = vor.u32 %v3436_v8, %v3435_v49  ;;  %v853_v6 = vsel %vm3754_vm6, 0, %v852_v54 }
 0x151   : > { %v1080_v57 = vshrl.u32 %v888_v45, 16  ;;  %v1083_v58 = vshll.u32 %v888_v45, 16  ;;  %2076 = vrot.lane.b32.xlu0 %v1644_v34, %s3607_s30  ;;  %v667_v51 = vmul.f32 %v4079_v44, %v616_v28  ;;  %v1514_v59 = vunpack.c.l.b16 %v1382_v50  ;;  %854 = vst [vmem:[#allocation2 + $0xa4] sm:$0x1] %v853_v6  ;;  %v1301_v50 = vld [vmem:[#allocation2 + $0x90] sm:$0xf] }
 0x152   : > { %v4187_v62 = vpop.permute.xlu2 %1901  ;;  %v1840_v48 = vrot.slane %v3437_v52, 1  ;;  %v2139_v28 = vsel %vm2135_vm13, %v2106_v33, %v4054_v19 }
 0x153   : > { %v1082_v3 = vrot.slane %v1080_v57, 7  ;;  %v2065_v4 = vpop.permute.xlu0 %2064  ;;  %v703_v55 = vadd.f32 %v4092_v53, %v667_v51  ;;  %v4195_v5 = vpack.c.b16 %v1514_v59, %v1514_v59  ;;  %1911 = vrot.lane.b32.xlu1 %v4128_v31, %s4987_s12  ;;  %v1656_v59 = vsel %vm1536_vm8, %v1651_v37, %v1655_v9 }
 0x154   : > { %v2301_v14 = vsel %vm2299_vm2, %v2268_v63, %v2065_v4  ;;  %v855_v4 = vld [vmem:[#allocation2 + $0xb0] sm:$0x1] }
 0x155   : > { %v1085_v17 = vor.u32 %v1083_v58, %v1082_v3  ;;  %v1087_v7 = vrot.slane %v1082_v3, 4  ;;  %2476 = vmatmul.bf16.vlgmr.msra.gmra.mxu1 %v2301_v14  ;;  %v735_v18 = vmax.f32 %v703_v55, 0.0  ;;  %v1841_v20 = vrot.slane %v4195_v5, 1  ;;  %v4201_v23 = vpop.permute.xlu1 %1899 }
 0x156   : > { %v2172_v58 = vsel %vm2168_vm14, %v2139_v28, %v4135_v47  ;;  %v1665_v28 = vshll.u32 %v4195_v5, 16 }
 0x157   : > { %v1086_v25 = vsel %vm3811_vm11, %v1078_v1, %v1085_v17  ;;  %v1299_v26 = vsel %vm3747_vm4, %v1087_v7, %v1298_v10  ;;  %v889_v27 = vpack.c.bf16 %v735_v18, %v735_v18  ;;  %v4212_v43 = vsel %vm1809_vm7, %v1840_v48, %v1841_v20  ;;  %v3576_v49 = vld [vmem:[#allocation2 + $0x84] sm:$0xe]  ;;  %v4245_v10 = vld [vmem:[#allocation2 + $0x78] sm:$0xff]  }
 0x158   : > { %1297 = vst.msk [vmem:[#allocation2 + $0x88] sm:$0xf] %vm745_vm3, %v1086_v25  ;;  %1745 = vrot.lane.b32.xlu2 %v1644_v34, %s4988_s21  ;;  %v618_v32 = vpop.f32.mrf.mxu0  ;;  %v799_v34 = vld [vmem:[#allocation2 + $0xa8] sm:$0x1]  ;;  %v2204_v6 = vsel %vm503_vm0, %v2172_v58, %v4177_v41  ;;  %v856_v41 = vsel %vm3754_vm6, 0, %v855_v4  ;;  %v1660_v29 = vshll.u32 %v4245_v10, 16 }
 0x159   : > { %1300 = vst [vmem:[#allocation2 + $0x8c] sm:$0x1] %v1299_v26  ;;  %v1089_v35 = vshrl.u32 %v889_v27, 16  ;;  %v1092_v36 = vshll.u32 %v889_v27, 16  ;;  %3296 = vmatmul.msk.bf16.gmra.mxu2 %vm2102_vm12, %v4212_v43  ;;  %2031 = vrot.lane.b32.xlu0 %v4128_v31, %s3606_s29  ;;  %v668_v61 = vmul.f32 %v4079_v44, %v618_v32  ;;  %v800_v8 = vsel %vm3747_vm4, 0, %v799_v34 }
 0x15a   : > { %v4222_v40 = vpop.permute.xlu2 %1866  ;;  %801 = vst [vmem:[#allocation2 + $0xa8] sm:$0x1] %v800_v8  ;;  %v1305_v26 = vld [vmem:[#allocation2 + $0x98] sm:$0x1]  ;;  %v1308_v4 = vld [vmem:[#allocation2 + $0x9c] sm:$0xf] }
 0x15b   : > { %v1091_v2 = vrot.slane %v1089_v35, 7  ;;  %v2020_v42 = vpop.permute.xlu0 %2019  ;;  %v704_v45 = vadd.f32 %v4092_v53, %v668_v61  ;;  %1876 = vrot.lane.b32.xlu1 %v4155_v22, %s3601_s27  ;;  %857 = vst [vmem:[#allocation2 + $0xb0] sm:$0x1] %v856_v41 }
 0x15d   : > { %v1094_v52 = vor.u32 %v1092_v36, %v1091_v2  ;;  %v736_v54 = vmax.f32 %v704_v45, 0.0  ;;  %v4231_v57 = vpop.permute.xlu1 %1864  ;;  %v1095_v18 = vrot.slane %v1091_v2, 4  ;;  %v1658_v45 = vshrl.u32 %v4245_v10, 16 }
 0x15f   : > { %v1302_v51 = vsel %vm3798_vm9, %v1094_v52, %v1301_v50  ;;  %v890_v63 = vpack.c.bf16 %v736_v54, %v736_v54  ;;  %v4238_v0 = vld [vmem:[#allocation2 + $0x84] sm:$0xff]  }
 0x160   : > { %v3575_v19 = vld [vmem:[#allocation2 + $0x84] sm:$0xf0]  ;;  %1303 = vst [vmem:[#allocation2 + $0x90] sm:$0xf] %v1302_v51  ;;  %1958 = vrot.lane.b32.xlu2 %v1656_v59, %s3605_s28  ;;  %v621_v1 = vpop.f32.mrf.mxu0  ;;  %v1383_v3 = vld [vmem:[#allocation2 + $0x8c] sm:$0x1] }
 0x161   : > { %v1097_v55 = vshrl.u32 %v890_v63, 16  ;;  %v1100_v47 = vshll.u32 %v890_v63, 16  ;;  %1996 = vrot.lane.b32.xlu0 %v4155_v22, %s3604_s25  ;;  %v669_v14 = vmul.f32 %v4079_v44, %v621_v1  ;;  %v1515_v48 = vunpack.c.l.b16 %v1383_v3  ;;  %v802_v51 = vld [vmem:[#allocation2 + $0xb4] sm:$0x1]  ;;  %v3505_v63 = vld [vmem:[#allocation2 + $0x18] sm:$0xff]  }
 0x162   : > { %v4248_v17 = vpop.permute.xlu2 %2068  ;;  %v3577_v7 = vor.u32 %v3576_v49, %v3575_v19  ;;  %v2237_v22 = vsel %vm2233_vm15, %v2204_v6, %v4117_v21  ;;  %v1662_v49 = vrot.slane %v1660_v29, 1  ;;  %v2108_v19 = vsel %vm2102_vm12, %v3505_v63, %v4133_v46 }
 0x163   : > { %v1099_v20 = vrot.slane %v1097_v55, 7  ;;  %v4252_v24 = vpop.permute.xlu0 %1984  ;;  %v705_v39 = vadd.f32 %v4092_v53, %v669_v14  ;;  %v4255_v25 = vpack.c.b16 %v1515_v48, %v1515_v48  ;;  %2078 = vrot.lane.b32.xlu1 %v1656_v59, %s3607_s30  ;;  %v2270_v61 = vsel %vm2266_vm1, %v2237_v22, %v2020_v42 }
 0x164   : > { %v1843_v27 = vrot.slane %v3577_v7, 1  ;;  %v2141_v3 = vsel %vm2135_vm13, %v2108_v19, %v4170_v30  ;;  %v1663_v55 = vor.u32 %v1662_v49, %v1658_v45  ;;  %v1312_v49 = vld [vmem:[#allocation2 + $0xa4] sm:$0x1]  ;;  %v1672_v63 = vshll.u32 %v4238_v0, 16 }
 0x165   : > { %v1102_v32 = vor.u32 %v1100_v47, %v1099_v20  ;;  %v1104_v33 = vrot.slane %v1099_v20, 4  ;;  %v737_v35 = vmax.f32 %v705_v39, 0.0  ;;  %v1844_v36 = vrot.slane %v4255_v25, 1  ;;  %v2067_v34 = vpop.permute.xlu1 %2066 }
 0x166   : > { %v2304_v37 = vsel %vm2299_vm2, %v2270_v61, %v2067_v34  ;;  %v1667_v47 = vrot.slane %v1665_v28, 1  ;;  %v2174_v46 = vsel %vm2168_vm14, %v2141_v3, %v4201_v23  ;;  %v858_v34 = vld [vmem:[#allocation2 + $0xbc] sm:$0x1] }
 0x167   : > { %v1103_v8 = vsel %vm3811_vm11, %v1095_v18, %v1102_v32  ;;  %v1306_v21 = vsel %vm3747_vm4, %v1104_v33, %v1305_v26  ;;  %v891_v2 = vpack.c.bf16 %v737_v35, %v737_v35  ;;  %2481 = vmatmul.bf16.gmra.mxu1 %v2304_v37  ;;  %v4272_v9 = vsel %vm1809_vm7, %v1843_v27, %v1844_v36  ;;  %v3439_v7 = vld [vmem:[#allocation2 + $0x90] sm:$0xe] }
 0x168   : > { %1304 = vst.msk [vmem:[#allocation2 + $0x94] sm:$0xf] %vm745_vm3, %v1103_v8  ;;  %1913 = vrot.lane.b32.xlu2 %v4245_v10, %s4987_s12  ;;  %v623_v42 = vpop.f32.mrf.mxu0  ;;  %v2206_v30 = vsel %vm503_vm0, %v2174_v46, %v4164_v13  ;;  %v1668_v22 = vsel %vm1536_vm8, %v1663_v55, %v1667_v47  ;;  %v1670_v46 = vshrl.u32 %v4238_v0, 16 }
 0x169   : > { %1307 = vst [vmem:[#allocation2 + $0x98] sm:$0x1] %v1306_v21  ;;  %v1106_v50 = vshrl.u32 %v891_v2, 16  ;;  %v1109_v52 = vshll.u32 %v891_v2, 16  ;;  %1747 = vrot.lane.b32.xlu0 %v1656_v59, %s4988_s21  ;;  %3297 = vmatmul.msk.bf16.gmra.mxu2 %vm2102_vm12, %v4272_v9  ;;  %v670_v54 = vmul.f32 %v4079_v44, %v623_v42  ;;  %v803_v59 = vsel %vm3747_vm4, 0, %v802_v51 }
 0x16a   : > { %v4280_v58 = vpop.permute.xlu2 %2023  ;;  %804 = vst [vmem:[#allocation2 + $0xb4] sm:$0x1] %v803_v59  ;;  %v2239_v36 = vsel %vm2233_vm15, %v2206_v30, %v4252_v24  ;;  %v859_v42 = vsel %vm3754_vm6, 0, %v858_v34 }
 0x16b   : > { %v1108_v6 = vrot.slane %v1106_v50, 7  ;;  %v4284_v1 = vpop.permute.xlu0 %1735  ;;  %v706_v5 = vadd.f32 %v4092_v53, %v670_v54  ;;  %2033 = vrot.lane.b32.xlu1 %v4245_v10, %s3606_s29  ;;  %860 = vst [vmem:[#allocation2 + $0xbc] sm:$0x1] %v859_v42 }
 0x16d   : > { %v1111_v14 = vor.u32 %v1109_v52, %v1108_v6  ;;  %v738_v48 = vmax.f32 %v706_v5, 0.0  ;;  %v2022_v41 = vpop.permute.xlu1 %2021  ;;  %v1112_v13 = vrot.slane %v1108_v6, 4 }
 0x16e   : > { %v2272_v45 = vsel %vm2266_vm1, %v2239_v36, %v2022_v41  ;;  %v2110_v36 = vsel %vm2102_vm12, %v3882_v16, %v4284_v1 }
 0x16f   : > { %v1309_v18 = vsel %vm3798_vm9, %v1111_v14, %v1308_v4  ;;  %v892_v20 = vpack.c.bf16 %v738_v48, %v738_v48  ;;  %v3438_v39 = vld [vmem:[#allocation2 + $0x90] sm:$0xf0]  ;;  %v1674_v14 = vrot.slane %v1672_v63, 1  ;;  %v1677_v48 = vshll.u32 %v4255_v25, 16  ;;  %v1319_v63 = vld [vmem:[#allocation2 + $0xb0] sm:$0x1] }
 0x170   : > { %1310 = vst [vmem:[#allocation2 + $0x9c] sm:$0xf] %v1309_v18  ;;  %1878 = vrot.lane.b32.xlu2 %v4212_v43, %s3601_s27  ;;  %v626_v26 = vpop.f32.mrf.mxu0  ;;  %v1384_v23 = vld [vmem:[#allocation2 + $0x98] sm:$0x1]  ;;  %v3440_v27 = vor.u32 %v3439_v7, %v3438_v39  ;;  %v1315_v39 = vld [vmem:[#allocation2 + $0xa8] sm:$0xf]  ;;  %v2143_v1 = vsel %vm2135_vm13, %v2110_v36, %v4231_v57 }
 0x171   : > { %v1114_v29 = vshrl.u32 %v892_v20, 16  ;;  %v1117_v32 = vshll.u32 %v892_v20, 16  ;;  %1960 = vrot.lane.b32.xlu0 %v1668_v22, %s3605_s28  ;;  %v671_v33 = vmul.f32 %v4079_v44, %v626_v26  ;;  %v1516_v35 = vunpack.c.l.b16 %v1384_v23 }
 0x172   : > { %v4306_v61 = vpop.permute.xlu2 %1988  ;;  %v1846_v24 = vrot.slane %v3440_v27, 1  ;;  %v1675_v27 = vor.u32 %v1674_v14, %v1670_v46  ;;  %v2176_v57 = vsel %vm2168_vm14, %v2143_v1, %v4187_v62 }
 0x173   : > { %v1116_v8 = vrot.slane %v1114_v29, 7  ;;  %v4308_v21 = vpop.permute.xlu0 %1948  ;;  %v707_v2 = vadd.f32 %v4092_v53, %v671_v33  ;;  %v4311_v37 = vpack.c.b16 %v1516_v35, %v1516_v35  ;;  %1998 = vrot.lane.b32.xlu1 %v4212_v43, %s3604_s25  ;;  %v2307_v43 = vsel %vm2299_vm2, %v2272_v45, %v4248_v17 }
 0x174   : > { %v1679_v29 = vrot.slane %v1677_v48, 1  ;;  %v4384_v48 = vpop.f32.mrf.mxu2 }
 0x175   : > { %v1119_v28 = vor.u32 %v1117_v32, %v1116_v8  ;;  %v1121_v50 = vrot.slane %v1116_v8, 4  ;;  %v739_v52 = vmax.f32 %v707_v2, 0.0  ;;  %v1847_v54 = vrot.slane %v4311_v37, 1  ;;  %v4319_v51 = vpop.permute.xlu1 %1986 }
 0x176   : > { %v4363_v45 = vsel %vm1536_vm8, %v1675_v27, %v1679_v29 }
 0x177   : > { %v1120_v19 = vsel %vm3811_vm11, %v1112_v13, %v1119_v28  ;;  %v1313_v6 = vsel %vm3747_vm4, %v1121_v50, %v1312_v49  ;;  %v893_v5 = vpack.c.bf16 %v739_v52, %v739_v52  ;;  %2486 = vmatmul.bf16.gmra.mxu1 %v2307_v43  ;;  %v4331_v59 = vsel %vm1809_vm7, %v1846_v24, %v1847_v54  ;;  %v3579_v20 = vld [vmem:[#allocation2 + $0x9c] sm:$0xe]  ;;  %v4370_v54 = vld [vmem:[#allocation2 + $0x90] sm:$0xff]  }
 0x178   : > { %1311 = vst.msk [vmem:[#allocation2 + $0xa0] sm:$0xf] %vm745_vm3, %v1120_v19  ;;  %2080 = vrot.lane.b32.xlu2 %v1668_v22, %s3607_s30  ;;  %v628_v3 = vpop.f32.mrf.mxu0  ;;  %v1684_v46 = vshll.u32 %v4370_v54, 16 }
 0x179   : > { %1314 = vst [vmem:[#allocation2 + $0xa4] sm:$0x1] %v1313_v6  ;;  %v1123_v4 = vshrl.u32 %v893_v5, 16  ;;  %v1126_v55 = vshll.u32 %v893_v5, 16  ;;  %1915 = vrot.lane.b32.xlu0 %v4238_v0, %s4987_s12  ;;  %3298 = vmatmul.msk.bf16.gmra.mxu2 %vm2102_vm12, %v4331_v59  ;;  %v672_v17 = vmul.f32 %v4079_v44, %v628_v3 }
 0x17a   : > { %v4338_v47 = vpop.permute.xlu2 %1739 }
 0x17b   : > { %v1125_v7 = vrot.slane %v1123_v4, 7  ;;  %v4342_v41 = vpop.permute.xlu0 %1903  ;;  %v708_v18 = vadd.f32 %v4092_v53, %v672_v17  ;;  %1749 = vrot.lane.b32.xlu1 %v1668_v22, %s4988_s21  ;;  %v805_v4 = vld [vmem:[#allocation2 + $0xc0] sm:$0x1] }
 0x17c   : > { %v806_v14 = vsel %vm3747_vm4, 0, %v805_v4  ;;  %v4423_v4 = vpop.f32.mrf.mxu2 }
 0x17d   : > { %v1128_v30 = vor.u32 %v1126_v55, %v1125_v7  ;;  %v740_v26 = vmax.f32 %v708_v18, 0.0  ;;  %v4346_v23 = vpop.permute.xlu1 %1737  ;;  %v1129_v24 = vrot.slane %v1125_v7, 4  ;;  %v2208_v7 = vsel %vm503_vm0, %v2176_v57, %v4308_v21  ;;  %807 = vst [vmem:[#allocation2 + $0xc0] sm:$0x1] %v806_v14 }
 0x17f   : > { %v1316_v32 = vsel %vm3798_vm9, %v1128_v30, %v1315_v39  ;;  %v894_v33 = vpack.c.bf16 %v740_v26, %v740_v26  ;;  %v4350_v25 = vld [vmem:[#allocation2 + $0x9c] sm:$0xff]   ;;  %v2241_v39 = vsel %vm2233_vm15, %v2208_v7, %v4319_v51  ;;  %v3506_v7 = vld [vmem:[#allocation2 + $0x30] sm:$0xff]  }
 0x180   : > { %v3578_v35 = vld [vmem:[#allocation2 + $0x9c] sm:$0xf0]  ;;  %1317 = vst [vmem:[#allocation2 + $0xa8] sm:$0xf] %v1316_v32  ;;  %2035 = vrot.lane.b32.xlu2 %v4238_v0, %s3606_s29  ;;  %v631_v22 = vpop.f32.mrf.mxu0  ;;  %v1385_v13 = vld [vmem:[#allocation2 + $0xa4] sm:$0x1] }
 0x181   : > { %v1131_v34 = vshrl.u32 %v894_v33, 16  ;;  %v1134_v8 = vshll.u32 %v894_v33, 16  ;;  %1880 = vrot.lane.b32.xlu0 %v4272_v9, %s3601_s27  ;;  %v673_v2 = vmul.f32 %v4079_v44, %v631_v22  ;;  %v1517_v49 = vunpack.c.l.b16 %v1385_v13 }
 0x182   : > { %v4360_v42 = vpop.permute.xlu2 %1952  ;;  %v3580_v16 = vor.u32 %v3579_v20, %v3578_v35  ;;  %v1682_v32 = vshrl.u32 %v4370_v54, 16  ;;  %v1689_v33 = vshll.u32 %v4311_v37, 16  ;;  %v2274_v22 = vsel %vm2266_vm1, %v2241_v39, %v4280_v58 }
 0x183   : > { %v1133_v28 = vrot.slane %v1131_v34, 7  ;;  %v4367_v50 = vpop.permute.xlu0 %1868  ;;  %v709_v52 = vadd.f32 %v4092_v53, %v673_v2  ;;  %1962 = vrot.lane.b32.xlu1 %v4363_v45, %s3605_s28  ;;  %v4374_v19 = vpack.c.b16 %v1517_v49, %v1517_v49  ;;  %v1322_v34 = vld [vmem:[#allocation2 + $0xb4] sm:$0xf]  ;;  %v861_v2 = vld [vmem:[#allocation2 + $0xc8] sm:$0x1] }
 0x184   : > { %v1849_v6 = vrot.slane %v3580_v16, 1  ;;  %v862_v37 = vsel %vm3754_vm6, 0, %v861_v2  ;;  %v1691_v58 = vrot.slane %v1689_v33, 1 }
 0x185   : > { %v1136_v5 = vor.u32 %v1134_v8, %v1133_v28  ;;  %v1138_v43 = vrot.slane %v1133_v28, 4  ;;  %v741_v3 = vmax.f32 %v709_v52, 0.0  ;;  %v4378_v55 = vpop.permute.xlu1 %1950  ;;  %v1850_v17 = vrot.slane %v4374_v19, 1  ;;  %863 = vst [vmem:[#allocation2 + $0xc8] sm:$0x1] %v862_v37 }
 0x187   : > { %v1137_v18 = vsel %vm3811_vm11, %v1129_v24, %v1136_v5  ;;  %v1320_v62 = vsel %vm3747_vm4, %v1138_v43, %v1319_v63  ;;  %v895_v20 = vpack.c.bf16 %v741_v3, %v741_v3  ;;  %v4398_v30 = vsel %vm1809_vm7, %v1849_v6, %v1850_v17  ;;  %v3442_v1 = vld [vmem:[#allocation2 + $0xa8] sm:$0xe] }
 0x188   : > { %1318 = vst.msk [vmem:[#allocation2 + $0xac] sm:$0xf] %vm745_vm3, %v1137_v18  ;;  %2000 = vrot.lane.b32.xlu2 %v4272_v9, %s3604_s25  ;;  %v633_v21 = vpop.f32.mrf.mxu0  ;;  %v1686_v9 = vrot.slane %v1684_v46, 1  ;;  %v2112_v18 = vsel %vm2102_vm12, %v3506_v7, %v4346_v23 }
 0x189   : > { %1321 = vst [vmem:[#allocation2 + $0xb0] sm:$0x1] %v1320_v62  ;;  %2082 = vrot.lane.b32.xlu0 %v4363_v45, %s3607_s30  ;;  %v1140_v26 = vshrl.u32 %v895_v20, 16  ;;  %v1143_v27 = vshll.u32 %v895_v20, 16  ;;  %3299 = vmatmul.msk.bf16.gmra.mxu2 %vm2102_vm12, %v4398_v30  ;;  %v674_v51 = vmul.f32 %v4079_v44, %v633_v21 }
 0x18a   : > { %v4405_v29 = vpop.permute.xlu2 %1907  ;;  %v1687_v28 = vor.u32 %v1686_v9, %v1682_v32  ;;  %v1326_v32 = vld [vmem:[#allocation2 + $0xbc] sm:$0x1] }
 0x18b   : > { %v1142_v35 = vrot.slane %v1140_v26, 7  ;;  %v2071_v36 = vpop.permute.xlu0 %2070  ;;  %v710_v13 = vadd.f32 %v4092_v53, %v674_v51  ;;  %1917 = vrot.lane.b32.xlu1 %v4370_v54, %s4987_s12 }
 0x18c   : > { %v2310_v8 = vsel %vm2299_vm2, %v2274_v22, %v2071_v36 }
 0x18d   : > { %v1145_v49 = vor.u32 %v1143_v27, %v1142_v35  ;;  %2491 = vmatmul.bf16.gmra.mxu1 %v2310_v8  ;;  %v742_v16 = vmax.f32 %v710_v13, 0.0  ;;  %v4417_v24 = vpop.permute.xlu1 %1905  ;;  %v1146_v62 = vrot.slane %v1142_v35, 4  ;;  %v2145_v35 = vsel %vm2135_vm13, %v2112_v18, %v4222_v40 }
 0x18e   : > { %v2178_v40 = vsel %vm2168_vm14, %v2145_v35, %v4342_v41  ;;  %v1701_v18 = vshll.u32 %v4374_v19, 16 }
 0x18f   : > { %v1323_v52 = vsel %vm3798_vm9, %v1145_v49, %v1322_v34  ;;  %v896_v63 = vpack.c.bf16 %v742_v16, %v742_v16  ;;  %v3441_v6 = vld [vmem:[#allocation2 + $0xa8] sm:$0xf0] }
 0x190   : > { %1324 = vst [vmem:[#allocation2 + $0xb4] sm:$0xf] %v1323_v52  ;;  %1751 = vrot.lane.b32.xlu2 %v4363_v45, %s4988_s21  ;;  %v1386_v5 = vld [vmem:[#allocation2 + $0xb0] sm:$0x1]  ;;  %v3443_v43 = vor.u32 %v3442_v1, %v3441_v6  ;;  %v636_v3 = vpop.f32.mrf.mxu0  ;;  %v1692_v45 = vsel %vm1536_vm8, %v1687_v28, %v1691_v58  ;;  %v2210_v28 = vsel %vm503_vm0, %v2178_v40, %v4378_v55  ;;  %v1696_v52 = vshll.u32 %v4350_v25, 16 }
 0x191   : > { %2037 = vrot.lane.b32.xlu0 %v4370_v54, %s3606_s29  ;;  %v1148_v57 = vshrl.u32 %v896_v63, 16  ;;  %v1151_v17 = vshll.u32 %v896_v63, 16  ;;  %v1518_v46 = vunpack.c.l.b16 %v1386_v5  ;;  %v675_v14 = vmul.f32 %v4079_v44, %v636_v3  ;;  %v4463_v63 = vpop.f32.mrf.mxu2  ;;  %v1329_v3 = vld [vmem:[#allocation2 + $0xc0] sm:$0xf] }
 0x192   : > { %v4430_v20 = vpop.permute.xlu2 %1872  ;;  %v1852_v27 = vrot.slane %v3443_v43, 1  ;;  %v1694_v55 = vshrl.u32 %v4350_v25, 16  ;;  %v1698_v7 = vrot.slane %v1696_v52, 1  ;;  %v1703_v60 = vrot.slane %v1701_v18, 1 }
 0x193   : > { %v1150_v39 = vrot.slane %v1148_v57, 7  ;;  %v2026_v21 = vpop.permute.xlu0 %2025  ;;  %v4433_v26 = vpack.c.b16 %v1518_v46, %v1518_v46  ;;  %v711_v51 = vadd.f32 %v4092_v53, %v675_v14  ;;  %2084 = vrot.lane.b32.xlu1 %v1692_v45, %s3607_s30 }
 0x195   : > { %v1153_v9 = vor.u32 %v1151_v17, %v1150_v39  ;;  %v1155_v33 = vrot.slane %v1150_v39, 4  ;;  %v1853_v36 = vrot.slane %v4433_v26, 1  ;;  %v743_v23 = vmax.f32 %v711_v51, 0.0  ;;  %v4440_v22 = vpop.permute.xlu1 %1870 }
 0x196   : > { %v1713_v18 = vshll.u32 %v4433_v26, 16  ;;  %v3374_v26 = vld [vmem:[%s4969_s7 + $0x18] sm:$0xff] }
 0x197   : > { %v1154_v13 = vsel %vm3811_vm11, %v1146_v62, %v1153_v9  ;;  %v1327_v34 = vsel %vm3747_vm4, %v1155_v33, %v1326_v32  ;;  %v4447_v8 = vsel %vm1809_vm7, %v1852_v27, %v1853_v36  ;;  %v897_v2 = vpack.c.bf16 %v743_v23, %v743_v23  ;;  %v3582_v43 = vld [vmem:[#allocation2 + $0xb4] sm:$0xe]  ;;  %2850 = vmatpush.bf16.msra.mxu3 %v3374_v26 }
 0x198   : > { %1325 = vst.msk [vmem:[#allocation2 + $0xb8] sm:$0xf] %vm745_vm3, %v1154_v13  ;;  %1964 = vrot.lane.b32.xlu2 %v1692_v45, %s3605_s28  ;;  %v638_v49 = vpop.f32.mrf.mxu0  ;;  %v1699_v9 = vor.u32 %v1698_v7, %v1694_v55 }
 0x199   : > { %1328 = vst [vmem:[#allocation2 + $0xbc] sm:$0x1] %v1327_v34  ;;  %2002 = vrot.lane.b32.xlu0 %v4331_v59, %s3604_s25  ;;  %3300 = vmatmul.msk.bf16.gmra.mxu2 %vm2102_vm12, %v4447_v8  ;;  %v1157_v16 = vshrl.u32 %v897_v2, 16  ;;  %v1160_v1 = vshll.u32 %v897_v2, 16  ;;  %v676_v37 = vmul.f32 %v4079_v44, %v638_v49  ;;  %v2243_v44 = vsel %vm2233_vm15, %v2210_v28, %v4306_v61  ;;  %v1333_v34 = vld [vmem:[#allocation2 + $0xc8] sm:$0x1] }
 0x19a   : > { %v4460_v58 = vpop.permute.xlu2 %2074  ;;  %v2276_v46 = vsel %vm2266_vm1, %v2243_v44, %v2026_v21  ;;  %v2114_v49 = vsel %vm2102_vm12, %v3939_v56, %v4338_v47  ;;  %v1704_v52 = vsel %vm1536_vm8, %v1699_v9, %v1703_v60  ;;  %v4510_v47 = vld [vmem:[#allocation2 + $0xa8] sm:$0xff]  }
 0x19b   : > { %v1991_v41 = vpop.permute.xlu0 %1990  ;;  %v1159_v6 = vrot.slane %v1157_v16, 7  ;;  %v712_v5 = vadd.f32 %v4092_v53, %v676_v37  ;;  %1882 = vrot.lane.b32.xlu1 %v4331_v59, %s3601_s27  ;;  %v2147_v37 = vsel %vm2135_vm13, %v2114_v49, %v4367_v50  ;;  %v808_v60 = vld [vmem:[#allocation2 + $0xcc] sm:$0x1]  ;;  %2851 = vmatpush.bf16.msra.mxu3 %v3373_v12 }
 0x19d   : > { %v1162_v57 = vor.u32 %v1160_v1, %v1159_v6  ;;  %v744_v17 = vmax.f32 %v712_v5, 0.0  ;;  %v2073_v14 = vpop.permute.xlu1 %2072  ;;  %v1163_v23 = vrot.slane %v1159_v6, 4  ;;  %v2180_v6 = vsel %vm2168_vm14, %v2147_v37, %v4417_v24 }
 0x19e   : > { %v2313_v53 = vsel %vm2299_vm2, %v2276_v46, %v2073_v14  ;;  %v2212_v11 = vsel %vm503_vm0, %v2180_v6, %v4360_v42 }
 0x19f   : > { %v1330_v62 = vsel %vm3798_vm9, %v1162_v57, %v1329_v3  ;;  %v898_v59 = vpack.c.bf16 %v744_v17, %v744_v17  ;;  %v4476_v39 = vld [vmem:[#allocation2 + $0xb4] sm:$0xff]   ;;  %2496 = vmatmul.bf16.gmra.mxu1 %v2313_v53  ;;  %v2245_v24 = vsel %vm2233_vm15, %v2212_v11, %v1991_v41  ;;  %v1708_v57 = vshll.u32 %v4510_v47, 16 }
 0x1a0   : > { %v3581_v27 = vld [vmem:[#allocation2 + $0xb4] sm:$0xf0]  ;;  %1919 = vrot.lane.b32.xlu2 %v4350_v25, %s4987_s12  ;;  %1331 = vst [vmem:[#allocation2 + $0xc0] sm:$0xf] %v1330_v62  ;;  %v1387_v61 = vld [vmem:[#allocation2 + $0xbc] sm:$0x1] }
 0x1a1   : > { %1753 = vrot.lane.b32.xlu0 %v1692_v45, %s4988_s21  ;;  %v1165_v21 = vshrl.u32 %v898_v59, 16  ;;  %v1168_v51 = vshll.u32 %v898_v59, 16  ;;  %v1519_v19 = vunpack.c.l.b16 %v1387_v61  ;;  %v3583_v33 = vor.u32 %v3582_v43, %v3581_v27  ;;  %v4489_v45 = vpop.f32.mrf.mxu2 }
 0x1a2   : > { %v4481_v32 = vpop.permute.xlu2 %2029  ;;  %v1706_v41 = vshrl.u32 %v4510_v47, 16  ;;  %v1710_v7 = vrot.slane %v1708_v57, 1  ;;  %v1718_v15 = vshrl.u32 %v4476_v39, 16 }
 0x1a3   : > { %v4483_v36 = vpop.permute.xlu0 %1741  ;;  %v1167_v35 = vrot.slane %v1165_v21, 7  ;;  %v4485_v13 = vpack.c.b16 %v1519_v19, %v1519_v19  ;;  %2039 = vrot.lane.b32.xlu1 %v4350_v25, %s3606_s29  ;;  %v1855_v2 = vrot.slane %v3583_v33, 1  ;;  %v1720_v33 = vshll.u32 %v4476_v39, 16 }
 0x1a5   : > { %v1170_v40 = vor.u32 %v1168_v51, %v1167_v35  ;;  %v1172_v16 = vrot.slane %v1167_v35, 4  ;;  %v1856_v1 = vrot.slane %v4485_v13, 1  ;;  %v2028_v28 = vpop.permute.xlu1 %2027  ;;  %v1715_v51 = vrot.slane %v1713_v18, 1 }
 0x1a6   : > { %v2278_v44 = vsel %vm2266_vm1, %v2245_v24, %v2028_v28  ;;  %v809_v35 = vsel %vm3747_vm4, 0, %v808_v60  ;;  %v1725_v6 = vshll.u32 %v4485_v13, 16  ;;  %v3371_v13 = vld [vmem:[%s4969_s7] sm:$0xff] }
 0x1a7   : > { %v1171_v5 = vsel %vm3811_vm11, %v1163_v23, %v1170_v40  ;;  %v1334_v43 = vsel %vm3747_vm4, %v1172_v16, %v1333_v34  ;;  %v4505_v56 = vsel %vm1809_vm7, %v1855_v2, %v1856_v1  ;;  %v3445_v55 = vld [vmem:[#allocation2 + $0xc0] sm:$0xe]  ;;  %v2316_v14 = vsel %vm2299_vm2, %v2278_v44, %v4460_v58  ;;  %v864_v34 = vld [vmem:[#allocation2 + $0xd4] sm:$0x1]  ;;  %v3507_v2 = vld [vmem:[#allocation2 + $0x48] sm:$0xff]  }
 0x1a8   : > { %2086 = vrot.lane.b32.xlu2 %v1704_v52, %s3607_s30  ;;  %1332 = vst.msk [vmem:[#allocation2 + $0xc4] sm:$0xf] %vm745_vm3, %v1171_v5  ;;  %v2116_v49 = vsel %vm2102_vm12, %v3507_v2, %v4483_v36  ;;  %v865_v16 = vsel %vm3754_vm6, 0, %v864_v34  ;;  %v3372_v5 = vld [vmem:[%s4969_s7 + $0x8] sm:$0xff]  ;;  %v1727_v44 = vrot.slane %v1725_v6, 1 }
 0x1a9   : > { %1966 = vrot.lane.b32.xlu0 %v1704_v52, %s3605_s28  ;;  %1335 = vst [vmem:[#allocation2 + $0xc8] sm:$0x1] %v1334_v43  ;;  %3301 = vmatmul.msk.bf16.gmra.mxu2 %vm2102_vm12, %v4505_v56  ;;  %v4523_v46 = vpop.f32.mrf.mxu2  ;;  %v2149_v37 = vsel %vm2135_vm13, %v2116_v49, %v4440_v22 }
 0x1aa   : > { %v4516_v50 = vpop.permute.xlu2 %1994  ;;  %810 = vst [vmem:[#allocation2 + $0xcc] sm:$0x1] %v809_v35  ;;  %v2182_v43 = vsel %vm2168_vm14, %v2149_v37, %v4405_v29  ;;  %2852 = vmatpush.bf16.msra.mxu3 %v3372_v5 }
 0x1ab   : > { %v1955_v3 = vpop.permute.xlu0 %1954  ;;  %2004 = vrot.lane.b32.xlu1 %v4398_v30, %s3604_s25  ;;  %866 = vst [vmem:[#allocation2 + $0xd4] sm:$0x1] %v865_v16 }
 0x1ac   : > { %v2214_v22 = vsel %vm503_vm0, %v2182_v43, %v1955_v3 }
 0x1ad   : > { %v1993_v17 = vpop.permute.xlu1 %1992 }
 0x1ae   : > { %v2247_v57 = vsel %vm2233_vm15, %v2214_v22, %v1993_v17  ;;  %2853 = vmatpush.bf16.msra.mxu3 %v3371_v13  ;;  %v3508_v22 = vld [vmem:[#allocation2 + $0x60] sm:$0xff]  }
 0x1af   : > { %v3444_v42 = vld [vmem:[#allocation2 + $0xc0] sm:$0xf0]  ;;  %2501 = vmatmul.bf16.gmra.mxu1 %v2316_v14  ;;  %v2280_v3 = vsel %vm2266_vm1, %v2247_v57, %v4481_v32 }
 0x1b0   : > { %1884 = vrot.lane.b32.xlu2 %v4398_v30, %s3601_s27  ;;  %v1388_v53 = vld [vmem:[#allocation2 + $0xc8] sm:$0x1]  ;;  %v3446_v62 = vor.u32 %v3445_v55, %v3444_v42  ;;  %v1711_v30 = vor.u32 %v1710_v7, %v1706_v41  ;;  %v3419_v41 = vld [vmem:[#allocation2 + $0xc0] sm:$0xff]  }
 0x1b1   : > { %1921 = vrot.lane.b32.xlu0 %v4510_v47, %s4987_s12  ;;  %v1928_v59 = vunpack.c.l.b16 %v1388_v53  ;;  %v4557_v1 = vpop.f32.mrf.mxu2  ;;  %v1933_v53 = vshll.u32 %v3419_v41, 16 }
 0x1b2   : > { %v4533_v27 = vpop.permute.xlu2 %1745  ;;  %v1977_v21 = vrot.slane %v3446_v62, 1  ;;  %v1716_v40 = vsel %vm1536_vm8, %v1711_v30, %v1715_v51 }
 0x1b3   : > { %v4535_v61 = vpop.permute.xlu0 %1909  ;;  %v4537_v58 = vpack.c.b16 %v1928_v59, %v1928_v59  ;;  %1755 = vrot.lane.b32.xlu1 %v1704_v52, %s4988_s21  ;;  %v1722_v52 = vrot.slane %v1720_v33, 1  ;;  %v1935_v30 = vrot.slane %v1933_v53, 1 }
 0x1b5   : > { %v1978_v19 = vrot.slane %v4537_v58, 1  ;;  %v1744_v9 = vpop.permute.xlu1 %1743  ;;  %v1723_v24 = vor.u32 %v1722_v52, %v1718_v15  ;;  %v1938_v51 = vshll.u32 %v4537_v58, 16  ;;  %v1389_v58 = vld [vmem:[#allocation2 + $0xd4] sm:$0x1] }
 0x1b6   : > { %v2118_v32 = vsel %vm2102_vm12, %v4018_v38, %v1744_v9  ;;  %v2050_v16 = vunpack.c.l.b16 %v1389_v58 }
 0x1b7   : > { %v4546_v23 = vsel %vm1809_vm7, %v1977_v21, %v1978_v19  ;;  %v1728_v14 = vsel %vm1536_vm8, %v1723_v24, %v1727_v44  ;;  %v2151_v62 = vsel %vm2135_vm13, %v2118_v32, %v4430_v20  ;;  %v1931_v21 = vshrl.u32 %v3419_v41, 16  ;;  %v4611_v19 = vld [vmem:[#allocation2 + $0xcc] sm:$0xf0] }
 0x1b8   : > { %2041 = vrot.lane.b32.xlu2 %v4510_v47, %s3606_s29  ;;  %v2184_v38 = vsel %vm2168_vm14, %v2151_v62, %v4535_v61  ;;  %v1940_v35 = vrot.slane %v1938_v51, 1  ;;  %v4626_v61 = vld [vmem:[%s4967_s5] ss:$0 sm:$0xff]  ;;  %v4641_v6 = vpack.c.b16 %v2050_v16, %v2050_v16  ;;  %v2120_v24 = vsel %vm2102_vm12, %v3508_v22, %v4533_v27 }
 0x1b9   : > { %2088 = vrot.lane.b32.xlu0 %v1716_v40, %s3607_s30  ;;  %3302 = vmatmul.msk.bf16.gmra.mxu2 %vm2102_vm12, %v4546_v23  ;;  %v1936_v33 = vor.u32 %v1935_v30, %v1931_v21 }
 0x1ba   : > { %v4565_v36 = vpop.permute.xlu2 %1958 }
 0x1bb   : > { %v4569_v28 = vpop.permute.xlu0 %1874  ;;  %1968 = vrot.lane.b32.xlu1 %v1716_v40, %s3605_s28  ;;  %v1941_v12 = vsel %vm1536_vm8, %v1936_v33, %v1940_v35 }
 0x1bc   : > { %v2153_v13 = vsel %vm2135_vm13, %v2120_v24, %v4569_v28 }
 0x1bd   : > { %v1957_v11 = vpop.permute.xlu1 %1956 }
 0x1be   : > { %v2216_v20 = vsel %vm503_vm0, %v2184_v38, %v1957_v11 }
 0x1bf   : > { %v2249_v34 = vsel %vm2233_vm15, %v2216_v20, %v4516_v50 }
 0x1c0   : > { %2006 = vrot.lane.b32.xlu2 %v4447_v8, %s3604_s25 }
 0x1c1   : > { %2043 = vrot.lane.b32.xlu0 %v4476_v39, %s3606_s29 }
 0x1c2   : > { %v4588_v55 = vpop.permute.xlu2 %1913 }
 0x1c3   : > { %v2077_v29 = vpop.permute.xlu0 %2076  ;;  %2090 = vrot.lane.b32.xlu1 %v1728_v14, %s3607_s30 }
 0x1c4   : > { %v2319_v17 = vsel %vm2299_vm2, %v2280_v3, %v2077_v29 }
 0x1c5   : > { %2506 = vmatmul.bf16.gmra.mxu1 %v2319_v17  ;;  %v1912_v42 = vpop.permute.xlu1 %1911 }
 0x1c6   : > { %v2186_v17 = vsel %vm2168_vm14, %v2153_v13, %v1912_v42 }
 0x1c8   : > { %1757 = vrot.lane.b32.xlu2 %v1716_v40, %s4988_s21 }
 0x1c9   : > { %1886 = vrot.lane.b32.xlu0 %v4447_v8, %s3601_s27  ;;  %v4609_v8 = vld [vmem:[#allocation2 + $0xcc] sm:$0xff]  }
 0x1ca   : > { %v4598_v7 = vpop.permute.xlu2 %1878  ;;  %v2055_v5 = vshll.u32 %v4609_v8, 16  ;;  %v2053_v3 = vshrl.u32 %v4609_v8, 16 }
 0x1cb   : > { %v2032_v18 = vpop.permute.xlu0 %2031  ;;  %1923 = vrot.lane.b32.xlu1 %v4476_v39, %s4987_s12 }
 0x1cc   : > { %v2282_v49 = vsel %vm2266_vm1, %v2249_v34, %v2032_v18  ;;  %v2218_v18 = vsel %vm503_vm0, %v2186_v17, %v4565_v36 }
 0x1cd   : > { %v4606_v59 = vpop.permute.xlu1 %1876 }
 0x1d0   : > { %1970 = vrot.lane.b32.xlu2 %v1728_v14, %s3605_s28 }
 0x1d1   : > { %2008 = vrot.lane.b32.xlu0 %v4505_v56, %s3604_s25 }
 0x1d2   : > { %v2477_v26 = vpop.f32.mrf.mxu1  ;;  %v2081_v9 = vpop.permute.xlu2 %2080 }
 0x1d3   : > { %v1997_v60 = vpop.permute.xlu0 %1996  ;;  %2045 = vrot.lane.b32.xlu1 %v3419_v41, %s3606_s29  ;;  %v2567_v2 = vadd.f32 %v4384_v48, %v2477_v26  ;;  %v4636_v48 = vld [vmem:[%s4968_s6] ss:$0 sm:$0xff] }
 0x1d4   : > { %v2251_v21 = vsel %vm2233_vm15, %v2218_v18, %v1997_v60 }
 0x1d5   : > { %v2079_v40 = vpop.permute.xlu1 %2078  ;;  %v2650_v50 = vmul.f32 %v4626_v61, %v2567_v2 }
 0x1d6   : > { %v2322_v37 = vsel %vm2299_vm2, %v2282_v49, %v2079_v40  ;;  %v2581_v49 = vpop.f32.mrf.mxu2 }
 0x1d7   : > { %2511 = vmatmul.bf16.gmra.mxu1 %v2322_v37  ;;  %v2686_v44 = vadd.f32 %v4636_v48, %v2650_v50 }
 0x1d8   : > { %2092 = vrot.lane.b32.xlu2 %v1941_v12, %s3607_s30 }
 0x1d9   : > { %1759 = vrot.lane.b32.xlu0 %v1728_v14, %s4988_s21  ;;  %v2057_v14 = vrot.slane %v2055_v5, 1  ;;  %v2718_v27 = vmax.f32 %v2686_v44, 0.0 }
 0x1da   : > { %v2479_v15 = vpop.f32.mrf.mxu1  ;;  %v4639_v52 = vpop.permute.xlu2 %2035 }
 0x1db   : > { %v2569_v43 = vadd.f32 %v4423_v4, %v2479_v15  ;;  %v1748_v11 = vpop.permute.xlu0 %1747  ;;  %1888 = vrot.lane.b32.xlu1 %v4505_v56, %s3601_s27  ;;  %v2060_v4 = vshll.u32 %v4641_v6, 16  ;;  %v2058_v53 = vor.u32 %v2057_v14, %v2053_v3 }
 0x1dc   : > { %v2122_v2 = vsel %vm2102_vm12, %v4128_v31, %v1748_v11 }
 0x1dd   : > { %v2651_v57 = vmul.f32 %v4626_v61, %v2569_v43  ;;  %v2034_v29 = vpop.permute.xlu1 %2033  ;;  %v2062_v62 = vrot.slane %v2060_v4, 1  ;;  %v2155_v40 = vsel %vm2135_vm13, %v2122_v2, %v4606_v59 }
 0x1de   : > { %v2284_v42 = vsel %vm2266_vm1, %v2251_v21, %v2034_v29  ;;  %v2583_v44 = vpop.f32.mrf.mxu2 }
 0x1df   : > { %v2687_v56 = vadd.f32 %v4636_v48, %v2651_v57  ;;  %v2063_v20 = vsel %vm1536_vm8, %v2058_v53, %v2062_v62  ;;  %v2325_v36 = vsel %vm2299_vm2, %v2284_v42, %v2081_v9 }
 0x1e0   : > { %1925 = vrot.lane.b32.xlu2 %v3419_v41, %s4987_s12 }
 0x1e1   : > { %1972 = vrot.lane.b32.xlu0 %v1941_v12, %s3605_s28  ;;  %v2719_v32 = vmax.f32 %v2687_v56, 0.0  ;;  %s350_s28 = sand.u32 1, %s3590_s14  }
 0x1e2   : > { %v4661_v28 = vpop.permute.xlu2 %2000  ;;  %s3153_s12 = sshll.u32 %s350_s28, 8  ;;  %s3072_s17 = scalar_lea.sflag [#allocation4], %s350_s28 }
 0x1e3   : > { %v1961_v30 = vpop.permute.xlu0 %1960  ;;  %v2750_v51 = vpack.c.bf16 %v2719_v32, %v2718_v27  ;;  %2010 = vrot.lane.b32.xlu1 %v4546_v23, %s3604_s25  ;;  %s4793_s21 = scalar_lea.vmem [#allocation3], %s3153_s12  ;;  %s3086_s25 = sshll.u32 %s3083_s11, 4  ;;  %s3087_s25 = int_to_ptr.hbm [resolvable:$true] %s3086_s25 }
 0x1e4   : > { %v2482_v41 = vpop.f32.mrf.mxu1  ;;  %s3084_s27 = sshll.u32 %s4793_s21, 4  ;;  %s3085_s27 = int_to_ptr.vmem [resolvable:$true] %s3084_s27 }
 0x1e5   : > { %3320 = vmatmul.msk.bf16.vlgmr.msra.gmra.mxu3 %vm503_vm0, %v2750_v51  ;;  %v1999_v38 = vpop.permute.xlu1 %1998  ;;  %v2572_v26 = vadd.f32 %v4463_v63, %v2482_v41 }
 0x1e6   : > { %v2586_v53 = vpop.f32.mrf.mxu2 }
 0x1e7   : > { %2516 = vmatmul.bf16.gmra.mxu1 %v2325_v36  ;;  %v2652_v33 = vmul.f32 %v4626_v61, %v2572_v26 }
 0x1e8   : > { %2047 = vrot.lane.b32.xlu2 %v4609_v8, %s3606_s29  ;;  %s3535_s29 = sshra.s32 %s3087_s25, 4  ;;  %s3536_s29 = int_to_ptr.hbm [resolvable:$true] %s3535_s29 }
 0x1e9   : > { %2094 = vrot.lane.b32.xlu0 %v2063_v20, %s3607_s30  ;;  %v2688_v9 = vadd.f32 %v4636_v48, %v2652_v33  ;;  %s3537_s30 = scalar_lea.hbm %s3536_s29, 256  ;;  %p3542_p0 = scmp.lt.s32.totalorder %s3536_s29, %s4972_s10 }
 0x1ea   : > { %v1752_v23 = vpop.permute.xlu2 %1751  ;;  %p3538_p11 = scmp.ne.s32.totalorder %s3536_s29, %s3537_s30  ;;  %p3543_p1 = scmp.lt.s32.totalorder %s3541_s20, %s3537_s30 }
 0x1eb   : > { %v1916_v60 = vpop.permute.xlu0 %1915  ;;  %v2720_v12 = vmax.f32 %v2688_v9, 0.0  ;;  %v2126_v33 = vsel %vm2102_vm12, %v4238_v0, %v1752_v23 }
 0x1ec   : > { %v2484_v35 = vpop.f32.mrf.mxu1  ;;  %p3539_p12 = pnand %p3538_p11, %p3703_p5  ;;  %p3544_p2 = por %p3543_p1, %p3542_p0 }
 0x1ed   : > { %v2574_v58 = vadd.f32 %v4489_v45, %v2484_v35  ;;  %v1750_v34 = vpop.permute.xlu1 %1749  ;;  %v2188_v45 = vsel %vm2168_vm14, %v2155_v40, %v4588_v55 }
 0x1ee   : > { %v2220_v43 = vsel %vm503_vm0, %v2188_v45, %v1961_v30  ;;  %v2124_v14 = vsel %vm2102_vm12, %v4245_v10, %v1750_v34  ;;  %v2588_v26 = vpop.f32.mrf.mxu2  ;;  %p3540_p13 = pneg %p3539_p12 }
 0x1ef   : > { %v2653_v63 = vmul.f32 %v4626_v61, %v2574_v58  ;;  %v2253_v11 = vsel %vm2233_vm15, %v2220_v43, %v1999_v38  ;;  %v2157_v56 = vsel %vm2135_vm13, %v2124_v14, %v4598_v7 }
 0x1f0   : > { %v2286_v59 = vsel %vm2266_vm1, %v2253_v11, %v4639_v52  ;;  %p3545_p3 = pnand %p3544_p2, %p3540_p13 }
 0x1f1   : > { %v2689_v8 = vadd.f32 %v4636_v48, %v2653_v63 }
 0x1f2   : > { %v1965_v15 = vpop.permute.xlu2 %1964 }
 0x1f3   : > { %v1881_v16 = vpop.permute.xlu0 %1880  ;;  %v2721_v37 = vmax.f32 %v2689_v8, 0.0 }
 0x1f4   : > { %v2487_v50 = vpop.f32.mrf.mxu1  ;;  %v2159_v58 = vsel %vm2135_vm13, %v2126_v33, %v1881_v16 }
 0x1f5   : > { %v1963_v5 = vpop.permute.xlu1 %1962  ;;  %v2751_v31 = vpack.c.bf16 %v2721_v37, %v2720_v12  ;;  %v2577_v22 = vadd.f32 %v4523_v46, %v2487_v50 }
 0x1f6   : > { %v2591_v50 = vpop.f32.mrf.mxu2 }
 0x1f7   : > { %3321 = vmatmul.msk.bf16.gmra.mxu3 %vm503_vm0, %v2751_v31  ;;  %v2654_v57 = vmul.f32 %v4626_v61, %v2577_v22 }
 0x1f9   : > { %v2690_v46 = vadd.f32 %v4636_v48, %v2654_v57 }
 0x1fa   : > { %v1920_v4 = vpop.permute.xlu2 %1919 }
 0x1fb   : > { %v2083_v24 = vpop.permute.xlu0 %2082  ;;  %v2722_v32 = vmax.f32 %v2690_v46, 0.0 }
 0x1fc   : > { %v2328_v55 = vsel %vm2299_vm2, %v2286_v59, %v2083_v24  ;;  %v2489_v13 = vpop.f32.mrf.mxu1 }
 0x1fd   : > { %2521 = vmatmul.bf16.gmra.mxu1 %v2328_v55  ;;  %v2579_v29 = vadd.f32 %v4557_v1, %v2489_v13  ;;  %v1918_v3 = vpop.permute.xlu1 %1917  ;;  %v2190_v1 = vsel %vm2168_vm14, %v2157_v56, %v1916_v60 }
 0x1fe   : > { %v2222_v10 = vsel %vm503_vm0, %v2190_v1, %v1963_v5  ;;  %v2192_v2 = vsel %vm2168_vm14, %v2159_v58, %v1918_v3  ;;  %v2593_v57 = vpop.f32.mrf.mxu2 }
 0x1ff   : > { %v2655_v17 = vmul.f32 %v4626_v61, %v2579_v29  ;;  %v2255_v51 = vsel %vm2233_vm15, %v2222_v10, %v4661_v28  ;;  %v2224_v40 = vsel %vm503_vm0, %v2192_v2, %v1965_v15 }
 0x201   : > { %v2691_v52 = vadd.f32 %v4636_v48, %v2655_v17 }
 0x202   : > { %v2087_v30 = vpop.permute.xlu2 %2086 }
 0x203   : > { %v2038_v27 = vpop.permute.xlu0 %2037  ;;  %v2723_v18 = vmax.f32 %v2691_v52, 0.0 }
 0x204   : > { %v2288_v41 = vsel %vm2266_vm1, %v2255_v51, %v2038_v27  ;;  %v3519_v27 = vld [vmem:[#allocation2 + $0xcc] sm:$0xe]  ;;  %v2100_v51 = vrot.slane %v4641_v6, 1 }
 0x205   : > { %v2085_v62 = vpop.permute.xlu1 %2084  ;;  %v2752_v21 = vpack.c.bf16 %v2723_v18, %v2722_v32  ;;  %v3520_v1 = vor.u32 %v3519_v27, %v4611_v19 }
 0x206   : > { %v2331_v38 = vsel %vm2299_vm2, %v2288_v41, %v2085_v62 }
 0x207   : > { %3322 = vmatmul.msk.bf16.gmra.mxu3 %vm503_vm0, %v2752_v21 }
 0x20a   : > { %v2492_v42 = vpop.f32.mrf.mxu1  ;;  %v1885_v9 = vpop.permute.xlu2 %1884 }
 0x20b   : > { %v2003_v7 = vpop.permute.xlu0 %2002  ;;  %v2582_v20 = vadd.f32 %v2581_v49, %v2492_v42  ;;  %v2596_v42 = vpop.f32.mrf.mxu2 }
 0x20c   : > { %v2257_v37 = vsel %vm2233_vm15, %v2224_v40, %v2003_v7 }
 0x20d   : > { %2526 = vmatmul.bf16.gmra.mxu1 %v2331_v38  ;;  %v1883_v36 = vpop.permute.xlu1 %1882  ;;  %v2656_v60 = vmul.f32 %v4626_v61, %v2582_v20 }
 0x20f   : > { %v2692_v63 = vadd.f32 %v4636_v48, %v2656_v60 }
 0x211   : > { %v2724_v0 = vmax.f32 %v2692_v63, 0.0 }
 0x212   : > { %v2494_v35 = vpop.f32.mrf.mxu1  ;;  %v2042_v11 = vpop.permute.xlu2 %2041 }
 0x213   : > { %v2584_v34 = vadd.f32 %v2583_v44, %v2494_v35  ;;  %v1754_v28 = vpop.permute.xlu0 %1753  ;;  %v2598_v2 = vpop.f32.mrf.mxu2 }
 0x214   : > { %v2128_v15 = vsel %vm2102_vm12, %v4370_v54, %v1754_v28 }
 0x215   : > { %v2657_v49 = vmul.f32 %v4626_v61, %v2584_v34  ;;  %v2040_v8 = vpop.permute.xlu1 %2039  ;;  %v2161_v59 = vsel %vm2135_vm13, %v2128_v15, %v1883_v36 }
 0x216   : > { %v2290_v23 = vsel %vm2266_vm1, %v2257_v37, %v2040_v8  ;;  %v2194_v29 = vsel %vm2168_vm14, %v2161_v59, %v1920_v4 }
 0x217   : > { %v2693_v12 = vadd.f32 %v4636_v48, %v2657_v49  ;;  %v2334_v31 = vsel %vm2299_vm2, %v2290_v23, %v2087_v30  ;;  %v2099_v30 = vrot.slane %v3520_v1, 1 }
 0x219   : > { %v2725_v16 = vmax.f32 %v2693_v12, 0.0  ;;  %v2101_v38 = vsel %vm1809_vm7, %v2099_v30, %v2100_v51 }
 0x21a   : > { %v2007_v17 = vpop.permute.xlu2 %2006  ;;  %3303 = vmatmul.msk.bf16.gmra.mxu2 %vm2102_vm12, %v2101_v38 }
 0x21b   : > { %v1967_v45 = vpop.permute.xlu0 %1966  ;;  %v2753_v5 = vpack.c.bf16 %v2725_v16, %v2724_v0 }
 0x21c   : > { %v2497_v43 = vpop.f32.mrf.mxu1  ;;  %v2226_v46 = vsel %vm503_vm0, %v2194_v29, %v1967_v45  ;;  %v2601_v45 = vpop.f32.mrf.mxu2 }
 0x21d   : > { %2531 = vmatmul.bf16.gmra.mxu1 %v2334_v31  ;;  %3323 = vmatmul.msk.bf16.gmra.mxu3 %vm503_vm0, %v2753_v5  ;;  %v2005_v22 = vpop.permute.xlu1 %2004  ;;  %v2587_v24 = vadd.f32 %v2586_v53, %v2497_v43 }
 0x21e   : > { %v2259_v56 = vsel %vm2233_vm15, %v2226_v46, %v2005_v22 }
 0x21f   : > { %v2658_v55 = vmul.f32 %v4626_v61, %v2587_v24  ;;  %v2292_v53 = vsel %vm2266_vm1, %v2259_v56, %v2042_v11 }
 0x221   : > { %v2694_v52 = vadd.f32 %v4636_v48, %v2658_v55 }
 0x222   : > { %v1758_v19 = vpop.permute.xlu2 %1757 }
 0x223   : > { %v1922_v44 = vpop.permute.xlu0 %1921  ;;  %v2726_v4 = vmax.f32 %v2694_v52, 0.0  ;;  %v2132_v5 = vsel %vm2102_vm12, %v4510_v47, %v1758_v19 }
 0x224   : > { %v2499_v13 = vpop.f32.mrf.mxu1 }
 0x225   : > { %v2589_v3 = vadd.f32 %v2588_v26, %v2499_v13  ;;  %v1756_v14 = vpop.permute.xlu1 %1755 }
 0x226   : > { %v2130_v20 = vsel %vm2102_vm12, %v4350_v25, %v1756_v14  ;;  %v2603_v14 = vpop.f32.mrf.mxu2 }
 0x227   : > { %v2659_v54 = vmul.f32 %v4626_v61, %v2589_v3  ;;  %v2163_v26 = vsel %vm2135_vm13, %v2130_v20, %v1885_v9 }
 0x228   : > { %v2196_v35 = vsel %vm2168_vm14, %v2163_v26, %v1922_v44 }
 0x229   : > { %v2695_v32 = vadd.f32 %v4636_v48, %v2659_v54 }
 0x22a   : > { %v1971_v12 = vpop.permute.xlu2 %1970 }
 0x22b   : > { %v2089_v18 = vpop.permute.xlu0 %2088  ;;  %v2727_v62 = vmax.f32 %v2695_v32, 0.0 }
 0x22c   : > { %v2337_v21 = vsel %vm2299_vm2, %v2292_v53, %v2089_v18  ;;  %v2502_v10 = vpop.f32.mrf.mxu1 }
 0x22d   : > { %2536 = vmatmul.bf16.gmra.mxu1 %v2337_v21  ;;  %v1969_v41 = vpop.permute.xlu1 %1968  ;;  %v2754_v7 = vpack.c.bf16 %v2727_v62, %v2726_v4  ;;  %v2592_v36 = vadd.f32 %v2591_v50, %v2502_v10 }
 0x22e   : > { %v2228_v28 = vsel %vm503_vm0, %v2196_v35, %v1969_v41  ;;  %v2606_v10 = vpop.f32.mrf.mxu2 }
 0x22f   : > { %3324 = vmatmul.msk.bf16.gmra.mxu3 %vm503_vm0, %v2754_v7  ;;  %v2660_v33 = vmul.f32 %v4626_v61, %v2592_v36  ;;  %v2261_v49 = vsel %vm2233_vm15, %v2228_v28, %v2007_v17 }
 0x231   : > { %v2696_v25 = vadd.f32 %v4636_v48, %v2660_v33 }
 0x232   : > { %v2093_v24 = vpop.permute.xlu2 %2092 }
 0x233   : > { %v2044_v60 = vpop.permute.xlu0 %2043  ;;  %v2728_v37 = vmax.f32 %v2696_v25, 0.0  ;;  %v4779_v25 = vld [vmem:[%s4970_s8] ss:$0 sm:$0xff] }
 0x234   : > { %v2504_v6 = vpop.f32.mrf.mxu1  ;;  %v2294_v9 = vsel %vm2266_vm1, %v2261_v49, %v2044_v60  ;;  %v4785_v49 = vld [vmem:[%s4971_s9] ss:$0 sm:$0xff] }
 0x235   : > { %v2594_v58 = vadd.f32 %v2593_v57, %v2504_v6  ;;  %v2091_v34 = vpop.permute.xlu1 %2090 }
 0x236   : > { %v2340_v23 = vsel %vm2299_vm2, %v2294_v9, %v2091_v34  ;;  %v2608_v33 = vpop.f32.mrf.mxu2 }
 0x237   : > { %v2661_v63 = vmul.f32 %v4626_v61, %v2594_v58 }
 0x239   : > { %v2697_v8 = vadd.f32 %v4636_v48, %v2661_v63 }
 0x23a   : > { %v1926_v27 = vpop.permute.xlu2 %1925 }
 0x23b   : > { %v1887_v40 = vpop.permute.xlu0 %1886  ;;  %v2729_v0 = vmax.f32 %v2697_v8, 0.0 }
 0x23c   : > { %v2165_v43 = vsel %vm2135_vm13, %v2132_v5, %v1887_v40 }
 0x23d   : > { %2541 = vmatmul.bf16.gmra.mxu1 %v2340_v23  ;;  %v1924_v16 = vpop.permute.xlu1 %1923  ;;  %v2755_v50 = vpack.c.bf16 %v2729_v0, %v2728_v37 }
 0x23e   : > { %v2198_v22 = vsel %vm2168_vm14, %v2165_v43, %v1924_v16  ;;  %v2611_v8 = vpop.f32.mrf.mxu2 }
 0x23f   : > { %3325 = vmatmul.msk.bf16.gmra.mxu3 %vm503_vm0, %v2755_v50  ;;  %v2230_v44 = vsel %vm503_vm0, %v2198_v22, %v1971_v12 }
 0x242   : > { %v2507_v31 = vpop.f32.mrf.mxu1  ;;  %v2048_v38 = vpop.permute.xlu2 %2047 }
 0x243   : > { %v2009_v11 = vpop.permute.xlu0 %2008  ;;  %v2597_v15 = vadd.f32 %v2596_v42, %v2507_v31 }
 0x244   : > { %v2263_v57 = vsel %vm2233_vm15, %v2230_v44, %v2009_v11 }
 0x245   : > { %v2046_v59 = vpop.permute.xlu1 %2045  ;;  %v2662_v55 = vmul.f32 %v4626_v61, %v2597_v15 }
 0x246   : > { %v2296_v13 = vsel %vm2266_vm1, %v2263_v57, %v2046_v59  ;;  %v2613_v11 = vpop.f32.mrf.mxu2 }
 0x247   : > { %v2343_v46 = vsel %vm2299_vm2, %v2296_v13, %v2093_v24  ;;  %v2698_v17 = vadd.f32 %v4636_v48, %v2662_v55 }
 0x249   : > { %v2730_v32 = vmax.f32 %v2698_v17, 0.0 }
 0x24a   : > { %v2509_v29 = vpop.f32.mrf.mxu1 }
 0x24b   : > { %v2599_v3 = vadd.f32 %v2598_v2, %v2509_v29  ;;  %v1760_v47 = vpop.permute.xlu0 %1759 }
 0x24c   : > { %v2134_v53 = vsel %vm2102_vm12, %v4476_v39, %v1760_v47 }
 0x24d   : > { %v2663_v52 = vmul.f32 %v4626_v61, %v2599_v3  ;;  %2546 = vmatmul.bf16.gmra.mxu1 %v2343_v46  ;;  %v1889_v56 = vpop.permute.xlu1 %1888 }
 0x24e   : > { %v2167_v1 = vsel %vm2135_vm13, %v2134_v53, %v1889_v56  ;;  %v2616_v55 = vpop.f32.mrf.mxu2 }
 0x24f   : > { %v2699_v54 = vadd.f32 %v4636_v48, %v2663_v52  ;;  %v2200_v30 = vsel %vm2168_vm14, %v2167_v1, %v1926_v27 }
 0x251   : > { %v2731_v18 = vmax.f32 %v2699_v54, 0.0 }
 0x253   : > { %v1973_v4 = vpop.permute.xlu0 %1972  ;;  %v2756_v62 = vpack.c.bf16 %v2731_v18, %v2730_v32 }
 0x254   : > { %v2512_v21 = vpop.f32.mrf.mxu1  ;;  %v2232_v42 = vsel %vm503_vm0, %v2200_v30, %v1973_v4 }
 0x255   : > { %3326 = vmatmul.msk.bf16.gmra.mxu3 %vm503_vm0, %v2756_v62  ;;  %v2011_v51 = vpop.permute.xlu1 %2010  ;;  %v2602_v41 = vadd.f32 %v2601_v45, %v2512_v21 }
 0x256   : > { %v2265_v7 = vsel %vm2233_vm15, %v2232_v42, %v2011_v51  ;;  %v2618_v27 = vpop.f32.mrf.mxu2 }
 0x257   : > { %v2298_v39 = vsel %vm2266_vm1, %v2265_v7, %v2048_v38  ;;  %v2664_v36 = vmul.f32 %v4626_v61, %v2602_v41 }
 0x259   : > { %v2700_v6 = vadd.f32 %v4636_v48, %v2664_v36 }
 0x25b   : > { %v2095_v20 = vpop.permute.xlu0 %2094  ;;  %v2732_v34 = vmax.f32 %v2700_v6, 0.0 }
 0x25c   : > { %v2346_v19 = vsel %vm2299_vm2, %v2298_v39, %v2095_v20  ;;  %v2514_v26 = vpop.f32.mrf.mxu1 }
 0x25d   : > { %2551 = vmatmul.bf16.gmra.mxu1 %v2346_v19  ;;  %v2604_v60 = vadd.f32 %v2603_v14, %v2514_v26 }
 0x25e   : > { %v2621_v38 = vpop.f32.mrf.mxu2 }
 0x25f   : > { %v2665_v35 = vmul.f32 %v4626_v61, %v2604_v60 }
 0x261   : > { %v2701_v58 = vadd.f32 %v4636_v48, %v2665_v35 }
 0x263   : > { %v2733_v28 = vmax.f32 %v2701_v58, 0.0 }
 0x264   : > { %v2517_v2 = vpop.f32.mrf.mxu1 }
 0x265   : > { %v2757_v63 = vpack.c.bf16 %v2733_v28, %v2732_v34  ;;  %v2607_v9 = vadd.f32 %v2606_v10, %v2517_v2 }
 0x266   : > { %v2623_v28 = vpop.f32.mrf.mxu2 }
 0x267   : > { %3327 = vmatmul.msk.bf16.gmra.mxu3 %vm503_vm0, %v2757_v63  ;;  %v2666_v0 = vmul.f32 %v4626_v61, %v2607_v9 }
 0x268   : > { %v2855_v40 = vpop.f32.mrf.mxu3 }
 0x269   : > { %v2939_v12 = vmul.f32 %v4779_v25, %v2855_v40  ;;  %v2702_v45 = vadd.f32 %v4636_v48, %v2666_v0 }
 0x26b   : > { %v2975_v37 = vadd.f32 %v4785_v49, %v2939_v12  ;;  %v2734_v24 = vmax.f32 %v2702_v45, 0.0 }
 0x26c   : > { %v2519_v16 = vpop.f32.mrf.mxu1 }
 0x26d   : > { %v3007_v23 = vmax.f32 %v2975_v37, 0.0  ;;  %v2609_v50 = vadd.f32 %v2608_v33, %v2519_v16 }
 0x26e   : > { %v2626_v16 = vpop.f32.mrf.mxu2 }
 0x26f   : > { %3039 = vst [vmem:[%s4793_s21] sm:$0xff] %v3007_v23  ;;  %v2667_v5 = vmul.f32 %v4626_v61, %v2609_v50 }
 0x270   : > { %v2857_v31 = vpop.f32.mrf.mxu3 }
 0x271   : > { %v2940_v43 = vmul.f32 %v4779_v25, %v2857_v31  ;;  %v2703_v22 = vadd.f32 %v4636_v48, %v2667_v5 }
 0x273   : > { %v2976_v15 = vadd.f32 %v4785_v49, %v2940_v43  ;;  %v2735_v59 = vmax.f32 %v2703_v22, 0.0 }
 0x275   : > { %v3008_v44 = vmax.f32 %v2976_v15, 0.0  ;;  %v2758_v57 = vpack.c.bf16 %v2735_v59, %v2734_v24 }
 0x277   : > { %3040 = vst [vmem:[%s4793_s21 + $0x8] sm:$0xff] %v3008_v44  ;;  %3328 = vmatmul.msk.bf16.gmra.mxu3 %vm503_vm0, %v2758_v57 }
 0x27a   : > { %v2522_v13 = vpop.f32.mrf.mxu1  ;;  %v2860_v29 = vpop.f32.mrf.mxu3 }
 0x27b   : > { %v2941_v3 = vmul.f32 %v4779_v25, %v2860_v29  ;;  %v2612_v47 = vadd.f32 %v2611_v8, %v2522_v13  ;;  %v2628_v29 = vpop.f32.mrf.mxu2 }
 0x27d   : > { %v2977_v14 = vadd.f32 %v4785_v49, %v2941_v3  ;;  %v2668_v17 = vmul.f32 %v4626_v61, %v2612_v47 }
 0x27f   : > { %v3009_v46 = vmax.f32 %v2977_v14, 0.0  ;;  %v2704_v18 = vadd.f32 %v4636_v48, %v2668_v17 }
 0x281   : > { %3041 = vst [vmem:[%s4793_s21 + $0x10] sm:$0xff] %v3009_v46  ;;  %v2736_v21 = vmax.f32 %v2704_v18, 0.0 }
 0x282   : > { %v2524_v52 = vpop.f32.mrf.mxu1  ;;  %v2862_v54 = vpop.f32.mrf.mxu3 }
 0x283   : > { %v2614_v56 = vadd.f32 %v2613_v11, %v2524_v52  ;;  %v2942_v32 = vmul.f32 %v4779_v25, %v2862_v54 }
 0x285   : > { %v2669_v53 = vmul.f32 %v4626_v61, %v2614_v56  ;;  %v2978_v1 = vadd.f32 %v4785_v49, %v2942_v32  ;;  %v2631_v56 = vpop.f32.mrf.mxu2 }
 0x287   : > { %v2705_v4 = vadd.f32 %v4636_v48, %v2669_v53  ;;  %v3010_v62 = vmax.f32 %v2978_v1, 0.0 }
 0x289   : > { %v2737_v10 = vmax.f32 %v2705_v4, 0.0  ;;  %3042 = vst [vmem:[%s4793_s21 + $0x18] sm:$0xff] %v3010_v62 }
 0x28a   : > { %v2527_v30 = vpop.f32.mrf.mxu1  ;;  %v2865_v51 = vpop.f32.mrf.mxu3 }
 0x28b   : > { %v2759_v42 = vpack.c.bf16 %v2737_v10, %v2736_v21  ;;  %v2943_v41 = vmul.f32 %v4779_v25, %v2865_v51  ;;  %v2617_v7 = vadd.f32 %v2616_v55, %v2527_v30 }
 0x28d   : > { %3329 = vmatmul.msk.bf16.gmra.mxu3 %vm503_vm0, %v2759_v42  ;;  %v2979_v39 = vadd.f32 %v4785_v49, %v2943_v41  ;;  %v2670_v36 = vmul.f32 %v4626_v61, %v2617_v7  ;;  %v2633_v41 = vpop.f32.mrf.mxu2 }
 0x28f   : > { %v3011_v20 = vmax.f32 %v2979_v39, 0.0  ;;  %v2706_v6 = vadd.f32 %v4636_v48, %v2670_v36 }
 0x291   : > { %3043 = vst [vmem:[%s4793_s21 + $0x20] sm:$0xff] %v3011_v20  ;;  %v2738_v63 = vmax.f32 %v2706_v6, 0.0 }
 0x292   : > { %v2529_v19 = vpop.f32.mrf.mxu1  ;;  %v2867_v60 = vpop.f32.mrf.mxu3 }
 0x293   : > { %v2619_v26 = vadd.f32 %v2618_v27, %v2529_v19  ;;  %v2944_v33 = vmul.f32 %v4779_v25, %v2867_v60 }
 0x295   : > { %v2671_v35 = vmul.f32 %v4626_v61, %v2619_v26  ;;  %v2980_v58 = vadd.f32 %v4785_v49, %v2944_v33  ;;  %v2636_v6 = vpop.f32.mrf.mxu2 }
 0x297   : > { %v2707_v34 = vadd.f32 %v4636_v48, %v2671_v35  ;;  %v3012_v2 = vmax.f32 %v2980_v58, 0.0 }
 0x299   : > { %v2739_v8 = vmax.f32 %v2707_v34, 0.0  ;;  %3044 = vst [vmem:[%s4793_s21 + $0x28] sm:$0xff] %v3012_v2 }
 0x29a   : > { %v2532_v9 = vpop.f32.mrf.mxu1 }
 0x29b   : > { %v2760_v40 = vpack.c.bf16 %v2739_v8, %v2738_v63  ;;  %v2622_v12 = vadd.f32 %v2621_v38, %v2532_v9 }
 0x29d   : > { %3330 = vmatmul.msk.bf16.gmra.mxu3 %vm503_vm0, %v2760_v40  ;;  %v2672_v0 = vmul.f32 %v4626_v61, %v2622_v12 }
 0x29f   : > { %v2708_v31 = vadd.f32 %v4636_v48, %v2672_v0  ;;  %v2638_v0 = vpop.f32.mrf.mxu2 }
 0x2a0   : > { %v2870_v37 = vpop.f32.mrf.mxu3 }
 0x2a1   : > { %v2945_v23 = vmul.f32 %v4779_v25, %v2870_v37  ;;  %v2740_v24 = vmax.f32 %v2708_v31, 0.0 }
 0x2a2   : > { %v2534_v50 = vpop.f32.mrf.mxu1 }
 0x2a3   : > { %v2981_v45 = vadd.f32 %v4785_v49, %v2945_v23  ;;  %v2624_v5 = vadd.f32 %v2623_v28, %v2534_v50 }
 0x2a5   : > { %v3013_v43 = vmax.f32 %v2981_v45, 0.0  ;;  %v2673_v11 = vmul.f32 %v4626_v61, %v2624_v5 }
 0x2a7   : > { %3045 = vst [vmem:[%s4793_s21 + $0x30] sm:$0xff] %v3013_v43  ;;  %v2709_v22 = vadd.f32 %v4636_v48, %v2673_v11  ;;  %v2641_v11 = vpop.f32.mrf.mxu2 }
 0x2a8   : > { %v2872_v15 = vpop.f32.mrf.mxu3 }
 0x2a9   : > { %v2741_v59 = vmax.f32 %v2709_v22, 0.0  ;;  %v2946_v44 = vmul.f32 %v4779_v25, %v2872_v15 }
 0x2aa   : > { %v2537_v57 = vpop.f32.mrf.mxu1 }
 0x2ab   : > { %v2982_v55 = vadd.f32 %v4785_v49, %v2946_v44  ;;  %v2761_v13 = vpack.c.bf16 %v2741_v59, %v2740_v24  ;;  %v2627_v47 = vadd.f32 %v2626_v16, %v2537_v57 }
 0x2ad   : > { %v3014_v3 = vmax.f32 %v2982_v55, 0.0  ;;  %3331 = vmatmul.msk.bf16.gmra.mxu3 %vm503_vm0, %v2761_v13  ;;  %v2674_v14 = vmul.f32 %v4626_v61, %v2627_v47 }
 0x2af   : > { %3046 = vst [vmem:[%s4793_s21 + $0x38] sm:$0xff] %v3014_v3  ;;  %v2710_v27 = vadd.f32 %v4636_v48, %v2674_v14 }
 0x2b1   : > { %v2742_v4 = vmax.f32 %v2710_v27, 0.0 }
 0x2b2   : > { %v2539_v46 = vpop.f32.mrf.mxu1  ;;  %v2875_v52 = vpop.f32.mrf.mxu3 }
 0x2b3   : > { %v2629_v17 = vadd.f32 %v2628_v29, %v2539_v46  ;;  %v2947_v54 = vmul.f32 %v4779_v25, %v2875_v52  ;;  %v2643_v46 = vpop.f32.mrf.mxu2 }
 0x2b5   : > { %v2675_v32 = vmul.f32 %v4626_v61, %v2629_v17  ;;  %v2983_v18 = vadd.f32 %v4785_v49, %v2947_v54 }
 0x2b7   : > { %v2711_v53 = vadd.f32 %v4636_v48, %v2675_v32  ;;  %v3015_v1 = vmax.f32 %v2983_v18, 0.0 }
 0x2b9   : > { %v2743_v62 = vmax.f32 %v2711_v53, 0.0  ;;  %3047 = vst [vmem:[%s4793_s21 + $0x40] sm:$0xff] %v3015_v1 }
 0x2ba   : > { %v2542_v21 = vpop.f32.mrf.mxu1  ;;  %v2877_v30 = vpop.f32.mrf.mxu3 }
 0x2bb   : > { %v2762_v10 = vpack.c.bf16 %v2743_v62, %v2742_v4  ;;  %v2948_v51 = vmul.f32 %v4779_v25, %v2877_v30  ;;  %v2632_v42 = vadd.f32 %v2631_v56, %v2542_v21 }
 0x2bd   : > { %3332 = vmatmul.msk.bf16.gmra.mxu3 %vm503_vm0, %v2762_v10  ;;  %v2984_v7 = vadd.f32 %v4785_v49, %v2948_v51  ;;  %v2676_v39 = vmul.f32 %v4626_v61, %v2632_v42 }
 0x2bf   : > { %v3016_v38 = vmax.f32 %v2984_v7, 0.0  ;;  %v2712_v60 = vadd.f32 %v4636_v48, %v2676_v39 }
 0x2c1   : > { %3048 = vst [vmem:[%s4793_s21 + $0x48] sm:$0xff] %v3016_v38  ;;  %v2744_v28 = vmax.f32 %v2712_v60, 0.0 }
 0x2c2   : > { %v2544_v20 = vpop.f32.mrf.mxu1  ;;  %v2880_v19 = vpop.f32.mrf.mxu3 }
 0x2c3   : > { %v2634_v36 = vadd.f32 %v2633_v41, %v2544_v20  ;;  %v2949_v26 = vmul.f32 %v4779_v25, %v2880_v19 }
 0x2c5   : > { %v2677_v33 = vmul.f32 %v4626_v61, %v2634_v36  ;;  %v2985_v35 = vadd.f32 %v4785_v49, %v2949_v26 }
 0x2c7   : > { %v2713_v58 = vadd.f32 %v4636_v48, %v2677_v33  ;;  %v3017_v34 = vmax.f32 %v2985_v35, 0.0 }
 0x2c9   : > { %v2745_v2 = vmax.f32 %v2713_v58, 0.0  ;;  %3049 = vst [vmem:[%s4793_s21 + $0x50] sm:$0xff] %v3017_v34 }
 0x2ca   : > { %v2547_v63 = vpop.f32.mrf.mxu1  ;;  %v2882_v9 = vpop.f32.mrf.mxu3 }
 0x2cb   : > { %v2763_v8 = vpack.c.bf16 %v2745_v2, %v2744_v28  ;;  %v2950_v40 = vmul.f32 %v4779_v25, %v2882_v9  ;;  %v2637_v12 = vadd.f32 %v2636_v6, %v2547_v63 }
 0x2cd   : > { %3333 = vmatmul.msk.bf16.gmra.mxu3 %vm503_vm0, %v2763_v8  ;;  %v2986_v37 = vadd.f32 %v4785_v49, %v2950_v40  ;;  %v2678_v16 = vmul.f32 %v4626_v61, %v2637_v12 }
 0x2cf   : > { %v3018_v23 = vmax.f32 %v2986_v37, 0.0  ;;  %v2714_v5 = vadd.f32 %v4636_v48, %v2678_v16 }
 0x2d1   : > { %3050 = vst [vmem:[%s4793_s21 + $0x58] sm:$0xff] %v3018_v23  ;;  %v2746_v15 = vmax.f32 %v2714_v5, 0.0 }
 0x2d2   : > { %v2549_v50 = vpop.f32.mrf.mxu1 }
 0x2d3   : > { %v2639_v45 = vadd.f32 %v2638_v0, %v2549_v50 }
 0x2d5   : > { %v2679_v31 = vmul.f32 %v4626_v61, %v2639_v45 }
 0x2d7   : > { %v2715_v43 = vadd.f32 %v4636_v48, %v2679_v31 }
 0x2d8   : > { %v2885_v22 = vpop.f32.mrf.mxu3 }
 0x2d9   : > { %v2747_v24 = vmax.f32 %v2715_v43, 0.0  ;;  %v2951_v59 = vmul.f32 %v4779_v25, %v2885_v22 }
 0x2da   : > { %v2552_v44 = vpop.f32.mrf.mxu1 }
 0x2db   : > { %v2764_v57 = vpack.c.bf16 %v2747_v24, %v2746_v15  ;;  %v2987_v55 = vadd.f32 %v4785_v49, %v2951_v59  ;;  %v2642_v29 = vadd.f32 %v2641_v11, %v2552_v44 }
 0x2dd   : > { %v3019_v13 = vmax.f32 %v2987_v55, 0.0  ;;  %3334 = vmatmul.msk.bf16.gmra.mxu3 %vm503_vm0, %v2764_v57  ;;  %v2680_v47 = vmul.f32 %v4626_v61, %v2642_v29 }
 0x2df   : > { %3051 = vst [vmem:[%s4793_s21 + $0x60] sm:$0xff] %v3019_v13  ;;  %v2716_v54 = vadd.f32 %v4636_v48, %v2680_v47 }
 0x2e0   : > { %v2887_v3 = vpop.f32.mrf.mxu3 }
 0x2e1   : > { %v2952_v14 = vmul.f32 %v4779_v25, %v2887_v3  ;;  %v2748_v53 = vmax.f32 %v2716_v54, 0.0 }
 0x2e2   : > { %v2554_v17 = vpop.f32.mrf.mxu1 }
 0x2e3   : > { %v2988_v52 = vadd.f32 %v4785_v49, %v2952_v14  ;;  %v2644_v56 = vadd.f32 %v2643_v46, %v2554_v17 }
 0x2e5   : > { %v3020_v27 = vmax.f32 %v2988_v52, 0.0  ;;  %v2681_v32 = vmul.f32 %v4626_v61, %v2644_v56 }
 0x2e7   : > { %3052 = vst [vmem:[%s4793_s21 + $0x68] sm:$0xff] %v3020_v27  ;;  %v2717_v18 = vadd.f32 %v4636_v48, %v2681_v32 }
 0x2e9   : > { %v2749_v1 = vmax.f32 %v2717_v18, 0.0 }
 0x2ea   : > { %v2890_v62 = vpop.f32.mrf.mxu3 }
 0x2eb   : > { %v2765_v4 = vpack.c.bf16 %v2749_v1, %v2748_v53  ;;  %v2953_v21 = vmul.f32 %v4779_v25, %v2890_v62 }
 0x2ed   : > { %3335 = vmatmul.msk.bf16.gmra.mxu3 %vm503_vm0, %v2765_v4  ;;  %v2989_v10 = vadd.f32 %v4785_v49, %v2953_v21 }
 0x2ef   : > { %v3021_v30 = vmax.f32 %v2989_v10, 0.0 }
 0x2f1   : > { %3053 = vst [vmem:[%s4793_s21 + $0x70] sm:$0xff] %v3021_v30 }
 0x2f2   : > { %v2892_v51 = vpop.f32.mrf.mxu3 }
 0x2f3   : > { %v2954_v61 = vmul.f32 %v4779_v25, %v2892_v51 }
 0x2f5   : > { %v2990_v42 = vadd.f32 %v4785_v49, %v2954_v61 }
 0x2f7   : > { %v3022_v48 = vmax.f32 %v2990_v42, 0.0 }
 0x2f9   : > { %3054 = vst [vmem:[%s4793_s21 + $0x78] sm:$0xff] %v3022_v48 }
 0x2fa   : > { %v2895_v41 = vpop.f32.mrf.mxu3 }
 0x2fb   : > { %v2955_v7 = vmul.f32 %v4779_v25, %v2895_v41 }
 0x2fd   : > { %v2991_v38 = vadd.f32 %v4785_v49, %v2955_v7 }
 0x2ff   : > { %v3023_v39 = vmax.f32 %v2991_v38, 0.0 }
 0x301   : > { %3055 = vst [vmem:[%s4793_s21 + $0x80] sm:$0xff] %v3023_v39 }
 0x302   : > { %v2897_v20 = vpop.f32.mrf.mxu3 }
 0x303   : > { %v2956_v36 = vmul.f32 %v4779_v25, %v2897_v20 }
 0x305   : > { %v2992_v19 = vadd.f32 %v4785_v49, %v2956_v36 }
 0x307   : > { %v3024_v26 = vmax.f32 %v2992_v19, 0.0 }
 0x309   : > { %3056 = vst [vmem:[%s4793_s21 + $0x88] sm:$0xff] %v3024_v26 }
 0x310   : > { %v2900_v60 = vpop.f32.mrf.mxu3 }
 0x311   : > { %v2957_v33 = vmul.f32 %v4779_v25, %v2900_v60 }
 0x313   : > { %v2993_v6 = vadd.f32 %v4785_v49, %v2957_v33 }
 0x315   : > { %v3025_v35 = vmax.f32 %v2993_v6, 0.0 }
 0x317   : > { %3057 = vst [vmem:[%s4793_s21 + $0x90] sm:$0xff] %v3025_v35 }
 0x318   : > { %v2902_v58 = vpop.f32.mrf.mxu3 }
 0x319   : > { %v2958_v34 = vmul.f32 %v4779_v25, %v2902_v58 }
 0x31b   : > { %v2994_v28 = vadd.f32 %v4785_v49, %v2958_v34 }
 0x31d   : > { %v3026_v2 = vmax.f32 %v2994_v28, 0.0 }
 0x31f   : > { %3058 = vst [vmem:[%s4793_s21 + $0x98] sm:$0xff] %v3026_v2 }
 0x320   : > { %v2905_v63 = vpop.f32.mrf.mxu3 }
 0x321   : > { %v2959_v8 = vmul.f32 %v4779_v25, %v2905_v63 }
 0x323   : > { %v2995_v9 = vadd.f32 %v4785_v49, %v2959_v8 }
 0x325   : > { %v3027_v40 = vmax.f32 %v2995_v9, 0.0 }
 0x327   : > { %3059 = vst [vmem:[%s4793_s21 + $0xa0] sm:$0xff] %v3027_v40 }
 0x328   : > { %v2907_v12 = vpop.f32.mrf.mxu3 }
 0x329   : > { %v2960_v37 = vmul.f32 %v4779_v25, %v2907_v12 }
 0x32b   : > { %v2996_v0 = vadd.f32 %v4785_v49, %v2960_v37 }
 0x32d   : > { %v3028_v23 = vmax.f32 %v2996_v0, 0.0 }
 0x32f   : > { %3060 = vst [vmem:[%s4793_s21 + $0xa8] sm:$0xff] %v3028_v23 }
 0x330   : > { %v2910_v16 = vpop.f32.mrf.mxu3 }
 0x331   : > { %v2961_v50 = vmul.f32 %v4779_v25, %v2910_v16 }
 0x333   : > { %v2997_v45 = vadd.f32 %v4785_v49, %v2961_v50 }
 0x335   : > { %v3029_v5 = vmax.f32 %v2997_v45, 0.0 }
 0x337   : > { %3061 = vst [vmem:[%s4793_s21 + $0xb0] sm:$0xff] %v3029_v5 }
 0x338   : > { %v2912_v31 = vpop.f32.mrf.mxu3 }
 0x339   : > { %v2962_v43 = vmul.f32 %v4779_v25, %v2912_v31 }
 0x33b   : > { %v2998_v11 = vadd.f32 %v4785_v49, %v2962_v43 }
 0x33d   : > { %v3030_v22 = vmax.f32 %v2998_v11, 0.0 }
 0x33f   : > { %3062 = vst [vmem:[%s4793_s21 + $0xb8] sm:$0xff] %v3030_v22 }
 0x340   : > { %v2915_v15 = vpop.f32.mrf.mxu3 }
 0x341   : > { %v2963_v24 = vmul.f32 %v4779_v25, %v2915_v15 }
 0x343   : > { %v2999_v59 = vadd.f32 %v4785_v49, %v2963_v24 }
 0x345   : > { %v3031_v44 = vmax.f32 %v2999_v59, 0.0 }
 0x347   : > { %3063 = vst [vmem:[%s4793_s21 + $0xc0] sm:$0xff] %v3031_v44 }
 0x348   : > { %v2917_v57 = vpop.f32.mrf.mxu3 }
 0x349   : > { %v2964_v55 = vmul.f32 %v4779_v25, %v2917_v57 }
 0x34b   : > { %v3000_v13 = vadd.f32 %v4785_v49, %v2964_v55 }
 0x34d   : > { %v3032_v29 = vmax.f32 %v3000_v13, 0.0 }
 0x34f   : > { %3064 = vst [vmem:[%s4793_s21 + $0xc8] sm:$0xff] %v3032_v29 }
 0x350   : > { %v2920_v3 = vpop.f32.mrf.mxu3 }
 0x351   : > { %v2965_v47 = vmul.f32 %v4779_v25, %v2920_v3 }
 0x353   : > { %v3001_v14 = vadd.f32 %v4785_v49, %v2965_v47 }
 0x355   : > { %v3033_v46 = vmax.f32 %v3001_v14, 0.0 }
 0x357   : > { %3065 = vst [vmem:[%s4793_s21 + $0xd0] sm:$0xff] %v3033_v46 }
 0x358   : > { %v2922_v17 = vpop.f32.mrf.mxu3 }
 0x359   : > { %v2966_v52 = vmul.f32 %v4779_v25, %v2922_v17 }
 0x35b   : > { %v3002_v56 = vadd.f32 %v4785_v49, %v2966_v52 }
 0x35d   : > { %v3034_v54 = vmax.f32 %v3002_v56, 0.0 }
 0x35f   : > { %3066 = vst [vmem:[%s4793_s21 + $0xd8] sm:$0xff] %v3034_v54 }
 0x360   : > { %v2925_v27 = vpop.f32.mrf.mxu3 }
 0x361   : > { %v2967_v32 = vmul.f32 %v4779_v25, %v2925_v27 }
 0x363   : > { %v3003_v18 = vadd.f32 %v4785_v49, %v2967_v32 }
 0x365   : > { %v3035_v53 = vmax.f32 %v3003_v18, 0.0 }
 0x367   : > { %3067 = vst [vmem:[%s4793_s21 + $0xe0] sm:$0xff] %v3035_v53 }
 0x368   : > { %v2927_v1 = vpop.f32.mrf.mxu3 }
 0x369   : > { %v2968_v4 = vmul.f32 %v4779_v25, %v2927_v1 }
 0x36b   : > { %v3004_v62 = vadd.f32 %v4785_v49, %v2968_v4 }
 0x36d   : > { %v3036_v21 = vmax.f32 %v3004_v62, 0.0 }
 0x36f   : > { %3068 = vst [vmem:[%s4793_s21 + $0xe8] sm:$0xff] %v3036_v21 }
 0x370   : > { %v2930_v10 = vpop.f32.mrf.mxu3 }
 0x371   : > { %v2969_v30 = vmul.f32 %v4779_v25, %v2930_v10 }
 0x373   : > { %v3005_v51 = vadd.f32 %v4785_v49, %v2969_v30 }
 0x375   : > { %v3037_v61 = vmax.f32 %v3005_v51, 0.0 }
 0x377   : > { %3069 = vst [vmem:[%s4793_s21 + $0xf0] sm:$0xff] %v3037_v61 }
 0x378   : > { %v2932_v42 = vpop.f32.mrf.mxu3 }
 0x379   : > { %v2970_v48 = vmul.f32 %v4779_v25, %v2932_v42 }
 0x37b   : > { %v3006_v41 = vadd.f32 %v4785_v49, %v2970_v48 }
 0x37d   : > { %v3038_v7 = vmax.f32 %v3006_v41, 0.0 }
 0x37f   : > { %3070 = vst [vmem:[%s4793_s21 + $0xf8] sm:$0xff] %v3038_v7 }
 0x380   : > { %3548 = shalt.err (!%p3545_p3)
}
 0x381   : > { %s3608_s28 = smov 128   ;;  %s3609_s21 = smov 8  }
 0x382   : > { %3447 = dma.vmem_to_hbm [thread:$0]  (%p3703_p5), %s3085_s27, 4096, %s3087_s25, %s3072_s17, %s3608_s28, %s3608_s28, %s3609_s21  }
 0x383 PF: > { %p3453_p4 = scmp.ge.s32.totalorder %s3598_s16, 2  ;;  %s3101_s12 = sand.u32 1, %s3586_s13  }
 0x384   : > { %s3102_s18 = scalar_lea.sflag [#allocation4], %s3101_s12 }
 0x385   : > { %p3450_p7 = pnand %p3453_p4, %p3707_p6 }
 0x387   : > { %p3451_p8 = pneg %p3450_p7 }
 0x389   : > { %3566 = dma.done.wait (%p3451_p8), %s3102_s18, 4096  }
 0x38a   : > { %3568 = vsyncadd (%p3451_p8), %s3102_s18, 4294963200  ;;  %p20_p9 = scmp.ge.s32.totalorder %s3690_s19, 4   ;;  %s4989_s13 = smov %s3590_s14 }
 0x38b   : > { %s4990_s14 = smov %s3594_s15  ;;  %s4991_s15 = smov %s3701_s22 }
 0x38c   : > { %s4992_s16 = smov %s3690_s19  ;;  %22 = sbr.rel (!%p20_p9) target bundleno = 3 (0x3), region = 97 }
 0x391   :  { %3108 = vsyncpa [#allocation4], 1 }
 0x392   :  { %3110 = vsyncpa [#allocation4 + $0x1], 1 }

</bundles_post_ra>
